<compile_context>
chip_gen: v7x
topology: tpu7x:2x2x1
jax: 0.10.0
libtpu: 0.0.40
codegen_flags: <defaults>
</compile_context>

<pallas_src>
import jax
import jax.numpy as jnp
from jax.experimental import pallas as pl
from jax.experimental.pallas import tpu as pltpu

# Small, TPU-friendly demo shapes.
VOCAB = 64
EMB_DIM = 128   # D, lane-aligned
BATCH = 16      # B
NEG_K = 8       # negative samples per positive pair


def _log_sigmoid(x):
    # Numerically stable log(sigmoid(x)) = min(x, 0) - log1p(exp(-|x|))
    return jnp.minimum(x, 0.0) - jnp.log1p(jnp.exp(-jnp.abs(x)))


def sgns_kernel(u_idx_ref, v_idx_ref, sign_ref,     # (tile_rows, 1) VMEM
                u_tab_ref, v_tab_ref,               # (VOCAB, D) VMEM-resident
                loss_ref):                          # (1, 1) resident accumulator
    # Zero the resident accumulator on the first grid step (grid is usually
    # just (1,), but this keeps the kernel correct when batch is tiled).
    @pl.when(pl.program_id(0) == 0)
    def _init():
        loss_ref[...] = jnp.zeros_like(loss_ref)

    n = u_idx_ref.shape[0]          # tile_b * (K + 1) rows in this tile
    vocab = u_tab_ref.shape[0]

    u_idx = u_idx_ref[...]          # (n, 1) int32
    v_idx = v_idx_ref[...]          # (n, 1) int32

    # One-hot gather via MXU: (n, V) bf16 one-hot  x  (V, D) bf16 table -> f32.
    lane_ids = jax.lax.broadcasted_iota(jnp.int32, (n, vocab), 1)
    onehot_u = (lane_ids == u_idx).astype(u_tab_ref.dtype)          # (n, V)
    onehot_v = (lane_ids == v_idx).astype(v_tab_ref.dtype)          # (n, V)

    u_rows = jnp.dot(onehot_u, u_tab_ref[...],
                     preferred_element_type=jnp.float32)             # (n, D)
    v_rows = jnp.dot(onehot_v, v_tab_ref[...],
                     preferred_element_type=jnp.float32)             # (n, D)

    # Unified pos/neg logits: one VPU mul, one XLU lane reduce.
    logits = jnp.sum(u_rows * v_rows, axis=-1, keepdims=True)        # (n, 1)

    # sign = +1 for positive rows, -1 for negative rows (precomputed in wrapper)
    score = _log_sigmoid(sign_ref[...] * logits)                     # (n, 1)

    # loss = -sum(pos_score) - sum(neg_score)
    loss_ref[...] = loss_ref[...] - jnp.sum(score, axis=0, keepdims=True)


def sgns_forward(u_weight, v_weight, pos_u, pos_v, neg_v, *, tile_b=None):
    """Scalar SGNS loss. Gather + dot + log-sigmoid + reduce fused in one kernel."""
    vocab, emb_dim = u_weight.shape
    batch = pos_u.shape[0]
    neg_k = neg_v.shape[1]
    rows_per_b = neg_k + 1

    if tile_b is None:
        # Collapse the grid to a single step for small batches; tile only as a
        # fallback for large batches (tile_b must then be a multiple of 8).
        tile_b = batch
    assert batch % tile_b == 0, "batch must be a multiple of tile_b"
    grid = (batch // tile_b,)
    tile_rows = tile_b * rows_per_b

    pos_u = pos_u.astype(jnp.int32)
    pos_v = pos_v.astype(jnp.int32)
    neg_v = neg_v.astype(jnp.int32)

    # Gather plan (index plumbing only, no FLOPs moved out of the kernel):
    #   row b*(K+1) + 0      -> (pos_u[b], pos_v[b])     sign +1
    #   row b*(K+1) + 1..K   -> (pos_u[b], neg_v[b, k])  sign -1
    u_all = jnp.repeat(pos_u, rows_per_b)[:, None]                           # (N, 1)
    v_all = jnp.concatenate([pos_v[:, None], neg_v], axis=1).reshape(-1, 1)  # (N, 1)
    sign = jnp.tile(
        jnp.concatenate([jnp.ones((1,), jnp.float32),
                         -jnp.ones((neg_k,), jnp.float32)]),
        batch,
    )[:, None]                                                               # (N, 1)

    idx_spec = pl.BlockSpec((tile_rows, 1), lambda i: (i, 0))
    # Whole tables resident in VMEM; constant index map => DMA'd once and
    # reused across grid steps.  (For multi-step grids, pipeline_mode=
    # pl.Buffered(1) would drop the pointless double-buffer of the tables.)
    table_spec = pl.BlockSpec((vocab, emb_dim), lambda i: (0, 0))

    out = pl.pallas_call(
        sgns_kernel,
        out_shape=jax.ShapeDtypeStruct((1, 1), jnp.float32),
        grid_spec=pltpu.PrefetchScalarGridSpec(
            num_scalar_prefetch=0,
            grid=grid,
            in_specs=[idx_spec, idx_spec, idx_spec, table_spec, table_spec],
            out_specs=pl.BlockSpec((1, 1), lambda i: (0, 0)),
        ),
        compiler_params=pltpu.CompilerParams(
            dimension_semantics=("arbitrary",),   # resident accumulator
        ),
    )(u_all, v_all, sign, u_weight, v_weight)
    return out[0, 0]


def sgns_reference(u_weight, v_weight, pos_u, pos_v, neg_v):
    emb_u = jnp.take(u_weight, pos_u, axis=0).astype(jnp.float32)
    emb_v = jnp.take(v_weight, pos_v, axis=0).astype(jnp.float32)
    neg_emb_v = jnp.take(v_weight, neg_v, axis=0).astype(jnp.float32)
    pos_score = jax.nn.log_sigmoid(jnp.sum(emb_u * emb_v, axis=1))
    neg_logits = jnp.sum(neg_emb_v * emb_u[:, None, :], axis=-1)
    neg_score = jax.nn.log_sigmoid(-neg_logits)
    return -jnp.sum(pos_score) - jnp.sum(neg_score)


if __name__ == "__main__":
    key = jax.random.PRNGKey(0)
    k_u, k_v, k_pu, k_pv, k_nv = jax.random.split(key, 5)

    init_range = 0.5 / EMB_DIM
    # NOTE: PyTorch init_emb() zeroes v_embedding; small non-zero values are
    # used here so the kernel math is exercised non-trivially.  Tables stored
    # in bf16 (MXU consumes them natively; accumulation is f32).
    u_weight = jax.random.uniform(
        k_u, (VOCAB, EMB_DIM), jnp.float32, -init_range, init_range
    ).astype(jnp.bfloat16)
    v_weight = jax.random.uniform(
        k_v, (VOCAB, EMB_DIM), jnp.float32, -init_range, init_range
    ).astype(jnp.bfloat16)

    pos_u = jax.random.randint(k_pu, (BATCH,), 0, VOCAB, dtype=jnp.int32)
    pos_v = jax.random.randint(k_pv, (BATCH,), 0, VOCAB, dtype=jnp.int32)
    neg_v = jax.random.randint(k_nv, (BATCH, NEG_K), 0, VOCAB, dtype=jnp.int32)

    loss = jax.jit(sgns_forward)(u_weight, v_weight, pos_u, pos_v, neg_v)
    loss = jax.block_until_ready(loss)

    ref = sgns_reference(u_weight, v_weight, pos_u, pos_v, neg_v)
    assert jnp.allclose(loss, ref, rtol=1e-5, atol=1e-4), (loss, ref)

    print("KERNEL_OK")
</pallas_src>

<mosaic_0001>
module attributes {stable_mosaic.version = 11 : i64} {
  func.func @sgns_kernel(%arg0: i32, %arg1: memref<144x1xi32, #tpu.memory_space<vmem>>, %arg2: memref<144x1xi32, #tpu.memory_space<vmem>>, %arg3: memref<144x1xf32, #tpu.memory_space<vmem>>, %arg4: memref<64x128xbf16, #tpu.memory_space<vmem>>, %arg5: memref<64x128xbf16, #tpu.memory_space<vmem>>, %arg6: memref<1x1xf32, #tpu.memory_space<vmem>>) attributes {dimension_semantics = [#tpu.dimension_semantics<arbitrary>], iteration_bounds = array<i64: 1>, scalar_prefetch = 0 : i64, scratch_operands = 0 : i64, tpu.core_type = #tpu.core_type<tc>, window_params = [{transform_indices = @transform_0, window_bounds = array<i64: 144, 1>}, {transform_indices = @transform_1, window_bounds = array<i64: 144, 1>}, {transform_indices = @transform_2, window_bounds = array<i64: 144, 1>}, {pipeline_mode = #tpu.pipeline_mode<synchronous>, transform_indices = @transform_3, window_bounds = array<i64: 64, 128>}, {pipeline_mode = #tpu.pipeline_mode<synchronous>, transform_indices = @transform_4, window_bounds = array<i64: 64, 128>}, {pipeline_mode = #tpu.pipeline_mode<synchronous>, transform_indices = @transform_5, window_bounds = array<i64: 1, 1>}]} {
    %c0_i32 = arith.constant 0 : i32
    %0 = arith.cmpi eq, %arg0, %c0_i32 : i32
    %1 = arith.extui %0 : i1 to i32
    %c0_i32_0 = arith.constant 0 : i32
    %2 = arith.cmpi ne, %1, %c0_i32_0 : i32
    scf.if %2 {
      %cst_19 = arith.constant 0.000000e+00 : f32
      %38 = vector.broadcast %cst_19 : f32 to vector<1x1xf32>
      %c0_20 = arith.constant 0 : index
      %c0_21 = arith.constant 0 : index
      %39 = vector.load %arg6[%c0_20, %c0_21] : memref<1x1xf32, #tpu.memory_space<vmem>>, vector<1x1xf32>
      tpu.vector_store %arg6[%c0_20, %c0_21], %38 {strides = array<i32>} : memref<1x1xf32, #tpu.memory_space<vmem>>, vector<1x1xf32>,
    } else {
    }
    %c0 = arith.constant 0 : index
    %c0_1 = arith.constant 0 : index
    %3 = vector.load %arg1[%c0, %c0_1] : memref<144x1xi32, #tpu.memory_space<vmem>>, vector<144x1xi32>
    %c0_2 = arith.constant 0 : index
    %c0_3 = arith.constant 0 : index
    %4 = vector.load %arg2[%c0_2, %c0_3] : memref<144x1xi32, #tpu.memory_space<vmem>>, vector<144x1xi32>
    %5 = tpu.iota {dimensions = array<i32: 1>} : vector<144x64xi32>
    %6 = vector.broadcast %3 : vector<144x1xi32> to vector<144x64xi32>
    %7 = arith.cmpi eq, %5, %6 : vector<144x64xi32>
    %8 = arith.extui %7 : vector<144x64xi1> to vector<144x64xi32>
    %9 = arith.sitofp %8 : vector<144x64xi32> to vector<144x64xf32>
    %10 = arith.truncf %9 : vector<144x64xf32> to vector<144x64xbf16>
    %11 = vector.broadcast %4 : vector<144x1xi32> to vector<144x64xi32>
    %12 = arith.cmpi eq, %5, %11 : vector<144x64xi32>
    %13 = arith.extui %12 : vector<144x64xi1> to vector<144x64xi32>
    %14 = arith.sitofp %13 : vector<144x64xi32> to vector<144x64xf32>
    %15 = arith.truncf %14 : vector<144x64xf32> to vector<144x64xbf16>
    %c0_4 = arith.constant 0 : index
    %c0_5 = arith.constant 0 : index
    %16 = vector.load %arg4[%c0_4, %c0_5] : memref<64x128xbf16, #tpu.memory_space<vmem>>, vector<64x128xbf16>
    %cst = arith.constant dense<0.000000e+00> : vector<144x128xf32>
    %17 = tpu.matmul %10, %16, %cst {dimension_numbers = #tpu.dot_dimension_numbers<[1], [0], [0], [1], [0, 0, 1, 1], [], []>} : vector<144x64xbf16>, vector<64x128xbf16>, vector<144x128xf32> -> vector<144x128xf32>
    %c0_6 = arith.constant 0 : index
    %c0_7 = arith.constant 0 : index
    %18 = vector.load %arg5[%c0_6, %c0_7] : memref<64x128xbf16, #tpu.memory_space<vmem>>, vector<64x128xbf16>
    %cst_8 = arith.constant dense<0.000000e+00> : vector<144x128xf32>
    %19 = tpu.matmul %15, %18, %cst_8 {dimension_numbers = #tpu.dot_dimension_numbers<[1], [0], [0], [1], [0, 0, 1, 1], [], []>} : vector<144x64xbf16>, vector<64x128xbf16>, vector<144x128xf32> -> vector<144x128xf32>
    %20 = arith.mulf %17, %19 : vector<144x128xf32>
    %cst_9 = arith.constant dense<0.000000e+00> : vector<144xf32>
    %21 = vector.multi_reduction <add>, %20, %cst_9 [1] : vector<144x128xf32> to vector<144xf32>
    %22 = vector.shape_cast %21 : vector<144xf32> to vector<144x1xf32>
    %c0_10 = arith.constant 0 : index
    %c0_11 = arith.constant 0 : index
    %23 = vector.load %arg3[%c0_10, %c0_11] : memref<144x1xf32, #tpu.memory_space<vmem>>, vector<144x1xf32>
    %24 = arith.mulf %23, %22 : vector<144x1xf32>
    %cst_12 = arith.constant 0.000000e+00 : f32
    %25 = vector.broadcast %cst_12 : f32 to vector<144x1xf32>
    %26 = arith.minimumf %24, %25 : vector<144x1xf32>
    %27 = math.absf %24 : vector<144x1xf32>
    %cst_13 = arith.constant 0.000000e+00 : f32
    %28 = vector.broadcast %cst_13 : f32 to vector<144x1xf32>
    %29 = arith.subf %28, %27 : vector<144x1xf32>
    %30 = math.exp %29 : vector<144x1xf32>
    %31 = math.log1p %30 : vector<144x1xf32>
    %32 = arith.subf %26, %31 : vector<144x1xf32>
    %c0_14 = arith.constant 0 : index
    %c0_15 = arith.constant 0 : index
    %33 = vector.load %arg6[%c0_14, %c0_15] : memref<1x1xf32, #tpu.memory_space<vmem>>, vector<1x1xf32>
    %cst_16 = arith.constant dense<0.000000e+00> : vector<1xf32>
    %34 = vector.multi_reduction <add>, %32, %cst_16 [0] : vector<144x1xf32> to vector<1xf32>
    %35 = vector.shape_cast %34 : vector<1xf32> to vector<1x1xf32>
    %36 = arith.subf %33, %35 : vector<1x1xf32>
    %c0_17 = arith.constant 0 : index
    %c0_18 = arith.constant 0 : index
    %37 = vector.load %arg6[%c0_17, %c0_18] : memref<1x1xf32, #tpu.memory_space<vmem>>, vector<1x1xf32>
    tpu.vector_store %arg6[%c0_17, %c0_18], %36 {strides = array<i32>} : memref<1x1xf32, #tpu.memory_space<vmem>>, vector<1x1xf32>,
    return
  }
  func.func @transform_0(%arg0: i32) -> (i32, i32) {
    %c0_i32 = arith.constant 0 : i32
    %c0_i32_0 = arith.constant 0 : i32
    return %arg0, %c0_i32 : i32, i32
  }
  func.func @transform_1(%arg0: i32) -> (i32, i32) {
    %c0_i32 = arith.constant 0 : i32
    %c0_i32_0 = arith.constant 0 : i32
    return %arg0, %c0_i32 : i32, i32
  }
  func.func @transform_2(%arg0: i32) -> (i32, i32) {
    %c0_i32 = arith.constant 0 : i32
    %c0_i32_0 = arith.constant 0 : i32
    return %arg0, %c0_i32 : i32, i32
  }
  func.func @transform_3(%arg0: i32) -> (i32, i32) {
    %c0_i32 = arith.constant 0 : i32
    %c0_i32_0 = arith.constant 0 : i32
    %c0_i32_1 = arith.constant 0 : i32
    return %c0_i32, %c0_i32_0 : i32, i32
  }
  func.func @transform_4(%arg0: i32) -> (i32, i32) {
    %c0_i32 = arith.constant 0 : i32
    %c0_i32_0 = arith.constant 0 : i32
    %c0_i32_1 = arith.constant 0 : i32
    return %c0_i32, %c0_i32_0 : i32, i32
  }
  func.func @transform_5(%arg0: i32) -> (i32, i32) {
    %c0_i32 = arith.constant 0 : i32
    %c0_i32_0 = arith.constant 0 : i32
    %c0_i32_1 = arith.constant 0 : i32
    return %c0_i32, %c0_i32_0 : i32, i32
  }
}

</mosaic_0001>

<bundles_post_ra>
// kernel: tile.6
= control target key start
LH: loop header
LB: loop body
LE: loop exit
PB: predicated region body
PF: predicated region fallthrough
CT: control target
= control target key end

     0   :  { %s28_s0 = inlined_call_operand.vmem [shape: f32[9], index: 0, kind: input, shape index: {}]   ;;  %s29_s1 = inlined_call_operand.vmem [shape: f32[16,9], index: 1, kind: output, shape index: {}]  }
   0x1   :  { %v4_v0 = vld [vmem:[%s28_s0] ss:$0 sm:$0xff] }
   0x2   :  { %5 = vst [vmem:[%s29_s1] sm:$0xff] %v4_v0  ;;  %8 = vst [vmem:[%s29_s1 + $0x8] sm:$0xff] %v4_v0 }

// kernel: tile.0
= control target key start
LH: loop header
LB: loop body
LE: loop exit
PB: predicated region body
PF: predicated region fallthrough
CT: control target
= control target key end

     0   :  { %s283_s10 = smov 126   ;;  %s284_s11 = smov 127   ;;  %vm3_vm0 = vcmask 7168   ;;  %s583_s0 = inlined_call_operand.vmem [shape: f32[16,9], index: 0, kind: input, shape index: {}]   ;;  %s584_s1 = inlined_call_operand.vmem [shape: f32[144,1], index: 1, kind: output, shape index: {}]  }
   0x1   :  { %v35_v0 = vld.sshfl [vmem:[%s583_s0] sm:$0xff pattern:$0x18f4b07e]   ;;  %v218_v2 = vld.sshfl [vmem:[%s583_s0 + $0x2] sm:$0xff pattern:$0x184b073a]  }
   0x2   :  { %v10_v1 = vld.sshfl [vmem:[%s583_s0] sm:$0xff pattern:$0xc18f4b07]   ;;  %36 = vrot.lane.b32.xlu1 %v35_v0, %s283_s10  ;;  %v210_v3 = vld.sshfl [vmem:[%s583_s0 + $0x2] sm:$0xff pattern:$0xc184b073]  }
   0x3   :  { %11 = vrot.lane.b32.xlu0 %v10_v1, %s284_s11  ;;  %s285_s16 = smov 125   ;;  %s286_s17 = smov 124   ;;  %v243_v4 = vld.sshfl [vmem:[%s583_s0 + $0x1] sm:$0xff pattern:$0x95c184b0]  }
   0x4   :  { %v104_v5 = vld.sshfl [vmem:[%s583_s0] sm:$0xff pattern:$0x8f4b07e3]   ;;  %s287_s30 = smov 123   ;;  %s289_s6 = smov 121  }
   0x5   :  { %v2_v6 = vld [vmem:[%s583_s0] sm:$0xff]   ;;  %v204_v7 = vld [vmem:[%s583_s0 + $0x8] sm:$0xff]   ;;  %s290_s7 = smov 120  }
   0x6   :  { %47 = vrot.lane.b32.xlu1 %v218_v2, %s283_s10  ;;  %4 = vst.msk [vmem:[%s584_s1] ss:$9 sm:$0xff] %vm3_vm0, %v2_v6   ;;  %205 = vst.msk [vmem:[%s584_s1 + $0x48] ss:$9 sm:$0xff] %vm3_vm0, %v204_v7  }
   0x7   :  { %24 = vrot.lane.b32.xlu0 %v210_v3, %s284_s11  ;;  %v252_v8 = vld.sshfl [vmem:[%s583_s0 + $0x1] sm:$0xff pattern:$0x5c184b07]   ;;  %v129_v9 = vld.sshfl [vmem:[%s583_s0] sm:$0xff pattern:$0xf4b07e3a]  }
   0x8   :  { %s288_s0 = smov 122  }
   0xa   :  { %70 = vrot.lane.b32.xlu1 %v218_v2, %s285_s16 }
   0xb   :  { %59 = vrot.lane.b32.xlu0 %v35_v0, %s285_s16 }
   0xe   :  { %93 = vrot.lane.b32.xlu1 %v218_v2, %s286_s17 }
   0xf   :  { %82 = vrot.lane.b32.xlu0 %v35_v0, %s286_s17 }
  0x12   :  { %118 = vrot.lane.b32.xlu1 %v243_v4, %s287_s30 }
  0x13   :  { %105 = vrot.lane.b32.xlu0 %v104_v5, %s287_s30 }
  0x16   :  { %143 = vrot.lane.b32.xlu1 %v252_v8, %s288_s0 }
  0x17   :  { %130 = vrot.lane.b32.xlu0 %v129_v9, %s288_s0 }
  0x1a   :  { %168 = vrot.lane.b32.xlu1 %v252_v8, %s289_s6 }
  0x1b   :  { %155 = vrot.lane.b32.xlu0 %v129_v9, %s289_s6 }
  0x1e   :  { %193 = vrot.lane.b32.xlu1 %v252_v8, %s290_s7 }
  0x1f   :  { %180 = vrot.lane.b32.xlu0 %v129_v9, %s290_s7 }
  0x74   :  { %v37_v10 = vpop.permute.xlu1 %36  }
  0x75   :  { %v12_v11 = vpop.permute.xlu0 %11   ;;  %215 = vst.msk [vmem:[%s584_s1 + $0x80] ss:$-63 sm:$0x7] %vm3_vm0, %v37_v10   ;;  %216 = vst.msk [vmem:[%s584_s1 + $0x122] ss:$-63 sm:$0x18] %vm3_vm0, %v37_v10  }
  0x76   :  { %217 = vst.msk [vmem:[%s584_s1 + $0x1c4] ss:$-63 sm:$0xe0] %vm3_vm0, %v37_v10   ;;  %206 = vst.msk [vmem:[%s584_s1 + $0x40] ss:$-63 sm:$0x3] %vm3_vm0, %v12_v11  }
  0x77   :  { %207 = vst.msk [vmem:[%s584_s1 + $0xe2] ss:$-63 sm:$0xc] %vm3_vm0, %v12_v11   ;;  %208 = vst.msk [vmem:[%s584_s1 + $0x184] ss:$-63 sm:$0x70] %vm3_vm0, %v12_v11  }
  0x78   :  { %209 = vst.msk [vmem:[%s584_s1 + $0x66] sm:$0x80] %vm3_vm0, %v12_v11   ;;  %v48_v12 = vpop.permute.xlu1 %47  }
  0x79   :  { %v25_v13 = vpop.permute.xlu0 %24   ;;  %219 = vst.msk [vmem:[%s584_s1 + $0x6e] ss:$-63 sm:$0x3] %vm3_vm0, %v48_v12   ;;  %220 = vst.msk [vmem:[%s584_s1 + $0xd1] ss:$-63 sm:$0xc] %vm3_vm0, %v48_v12  }
  0x7a   :  { %221 = vst.msk [vmem:[%s584_s1 + $0x173] ss:$-63 sm:$0x30] %vm3_vm0, %v48_v12   ;;  %222 = vst.msk [vmem:[%s584_s1 + $0x1d6] ss:$-63 sm:$0xc0] %vm3_vm0, %v48_v12  }
  0x7b   :  { %211 = vst.msk [vmem:[%s584_s1 + $0x2e] ss:$36 sm:$0x3] %vm3_vm0, %v25_v13   ;;  %212 = vst.msk [vmem:[%s584_s1 - $0xb3] ss:$99 sm:$0xc] %vm3_vm0, %v25_v13  }
  0x7c   :  { %213 = vst.msk [vmem:[%s584_s1 - $0x59] ss:$36 sm:$0x30] %vm3_vm0, %v25_v13   ;;  %214 = vst.msk [vmem:[%s584_s1 - $0x236] ss:$99 sm:$0xc0] %vm3_vm0, %v25_v13   ;;  %v71_v14 = vpop.permute.xlu1 %70  }
  0x7d   :  { %v60_v15 = vpop.permute.xlu0 %59   ;;  %227 = vst.msk [vmem:[%s584_s1 + $0x6f] ss:$-63 sm:$0x3] %vm3_vm0, %v71_v14   ;;  %228 = vst.msk [vmem:[%s584_s1 + $0xd2] ss:$-63 sm:$0xc] %vm3_vm0, %v71_v14  }
  0x7e   :  { %229 = vst.msk [vmem:[%s584_s1 + $0x174] ss:$-63 sm:$0x30] %vm3_vm0, %v71_v14   ;;  %230 = vst.msk [vmem:[%s584_s1 + $0x1d7] ss:$-63 sm:$0xc0] %vm3_vm0, %v71_v14  }
  0x7f   :  { %223 = vst.msk [vmem:[%s584_s1 + $0x81] ss:$-63 sm:$0x7] %vm3_vm0, %v60_v15   ;;  %224 = vst.msk [vmem:[%s584_s1 + $0x123] ss:$-63 sm:$0x18] %vm3_vm0, %v60_v15  }
  0x80   :  { %225 = vst.msk [vmem:[%s584_s1 + $0x1c5] ss:$-63 sm:$0xe0] %vm3_vm0, %v60_v15   ;;  %v94_v16 = vpop.permute.xlu1 %93  }
  0x81   :  { %v83_v17 = vpop.permute.xlu0 %82   ;;  %235 = vst.msk [vmem:[%s584_s1 + $0x70] ss:$-63 sm:$0x3] %vm3_vm0, %v94_v16   ;;  %236 = vst.msk [vmem:[%s584_s1 + $0xd3] ss:$-63 sm:$0xc] %vm3_vm0, %v94_v16  }
  0x82   :  { %237 = vst.msk [vmem:[%s584_s1 + $0x175] ss:$-63 sm:$0x30] %vm3_vm0, %v94_v16   ;;  %238 = vst.msk [vmem:[%s584_s1 + $0x1d8] ss:$-63 sm:$0xc0] %vm3_vm0, %v94_v16  }
  0x83   :  { %231 = vst.msk [vmem:[%s584_s1 + $0x82] ss:$-63 sm:$0x7] %vm3_vm0, %v83_v17   ;;  %232 = vst.msk [vmem:[%s584_s1 + $0x124] ss:$-63 sm:$0x18] %vm3_vm0, %v83_v17  }
  0x84   :  { %233 = vst.msk [vmem:[%s584_s1 + $0x1c6] ss:$-63 sm:$0xe0] %vm3_vm0, %v83_v17   ;;  %v119_v18 = vpop.permute.xlu1 %118  }
  0x85   :  { %v106_v19 = vpop.permute.xlu0 %105   ;;  %244 = vst.msk [vmem:[%s584_s1 + $0xe] ss:$99 sm:$0x3] %vm3_vm0, %v119_v18   ;;  %245 = vst.msk [vmem:[%s584_s1 - $0x16] ss:$36 sm:$0xc] %vm3_vm0, %v119_v18  }
  0x86   :  { %246 = vst.msk [vmem:[%s584_s1 - $0x175] ss:$99 sm:$0x30] %vm3_vm0, %v119_v18   ;;  %247 = vst.msk [vmem:[%s584_s1 - $0x9d] ss:$36 sm:$0xc0] %vm3_vm0, %v119_v18  }
  0x87   :  { %239 = vst.msk [vmem:[%s584_s1 + $0x20] ss:$99 sm:$0x3] %vm3_vm0, %v106_v19   ;;  %240 = vst.msk [vmem:[%s584_s1 + $0xc2] ss:$-63 sm:$0xc] %vm3_vm0, %v106_v19  }
  0x88   :  { %241 = vst.msk [vmem:[%s584_s1 + $0x164] ss:$-63 sm:$0x30] %vm3_vm0, %v106_v19   ;;  %242 = vst.msk [vmem:[%s584_s1 + $0x206] ss:$-63 sm:$0xc0] %vm3_vm0, %v106_v19   ;;  %v144_v20 = vpop.permute.xlu1 %143  }
  0x89   :  { %v131_v21 = vpop.permute.xlu0 %130   ;;  %253 = vst.msk [vmem:[%s584_s1 + $0x4e] ss:$-63 sm:$0x3] %vm3_vm0, %v144_v20   ;;  %254 = vst.msk [vmem:[%s584_s1 + $0xf0] ss:$-63 sm:$0xc] %vm3_vm0, %v144_v20  }
  0x8a   :  { %255 = vst.msk [vmem:[%s584_s1 + $0x153] ss:$-63 sm:$0x30] %vm3_vm0, %v144_v20   ;;  %256 = vst.msk [vmem:[%s584_s1 + $0x1f5] ss:$-63 sm:$0xc0] %vm3_vm0, %v144_v20  }
  0x8b   :  { %248 = vst.msk [vmem:[%s584_s1 + $0x60] ss:$-63 sm:$0x3] %vm3_vm0, %v131_v21   ;;  %249 = vst.msk [vmem:[%s584_s1 + $0x102] ss:$-63 sm:$0x1c] %vm3_vm0, %v131_v21  }
  0x8c   :  { %250 = vst.msk [vmem:[%s584_s1 + $0x1a4] ss:$-63 sm:$0x60] %vm3_vm0, %v131_v21   ;;  %251 = vst.msk [vmem:[%s584_s1 + $0x86] sm:$0x80] %vm3_vm0, %v131_v21   ;;  %v169_v22 = vpop.permute.xlu1 %168  }
  0x8d   :  { %v156_v23 = vpop.permute.xlu0 %155   ;;  %262 = vst.msk [vmem:[%s584_s1 + $0x4f] ss:$-63 sm:$0x3] %vm3_vm0, %v169_v22   ;;  %263 = vst.msk [vmem:[%s584_s1 + $0xf1] ss:$-63 sm:$0xc] %vm3_vm0, %v169_v22  }
  0x8e   :  { %264 = vst.msk [vmem:[%s584_s1 + $0x154] ss:$-63 sm:$0x30] %vm3_vm0, %v169_v22   ;;  %265 = vst.msk [vmem:[%s584_s1 + $0x1f6] ss:$-63 sm:$0xc0] %vm3_vm0, %v169_v22  }
  0x8f   :  { %257 = vst.msk [vmem:[%s584_s1 + $0x61] ss:$-63 sm:$0x3] %vm3_vm0, %v156_v23   ;;  %258 = vst.msk [vmem:[%s584_s1 + $0x103] ss:$-63 sm:$0x1c] %vm3_vm0, %v156_v23  }
  0x90   :  { %259 = vst.msk [vmem:[%s584_s1 + $0x1a5] ss:$-63 sm:$0x60] %vm3_vm0, %v156_v23   ;;  %260 = vst.msk [vmem:[%s584_s1 + $0x87] sm:$0x80] %vm3_vm0, %v156_v23   ;;  %v194_v24 = vpop.permute.xlu1 %193  }
  0x91   :  { %v181_v25 = vpop.permute.xlu0 %180   ;;  %271 = vst.msk [vmem:[%s584_s1 + $0x50] ss:$-63 sm:$0x3] %vm3_vm0, %v194_v24   ;;  %272 = vst.msk [vmem:[%s584_s1 + $0xf2] ss:$-63 sm:$0xc] %vm3_vm0, %v194_v24  }
  0x92   :  { %273 = vst.msk [vmem:[%s584_s1 + $0x155] ss:$-63 sm:$0x30] %vm3_vm0, %v194_v24   ;;  %274 = vst.msk [vmem:[%s584_s1 + $0x1f7] ss:$-63 sm:$0xc0] %vm3_vm0, %v194_v24  }
  0x93   :  { %266 = vst.msk [vmem:[%s584_s1 + $0x62] ss:$-63 sm:$0x3] %vm3_vm0, %v181_v25   ;;  %267 = vst.msk [vmem:[%s584_s1 + $0x104] ss:$-63 sm:$0x1c] %vm3_vm0, %v181_v25  }
  0x94   :  { %268 = vst.msk [vmem:[%s584_s1 + $0x1a6] ss:$-63 sm:$0x60] %vm3_vm0, %v181_v25   ;;  %269 = vst.msk [vmem:[%s584_s1 + $0x88] sm:$0x80] %vm3_vm0, %v181_v25  }

// kernel: sgns_forward.1
= control target key start
LH: loop header
LB: loop body
LE: loop exit
PB: predicated region body
PF: predicated region fallthrough
CT: control target
= control target key end

     0   :  { %v1335_v2 = vmov 0   ;;  %v1336_v5 = vmov 0.0   ;;  %vm1337_vm0 = vmmov 0   ;;  %s1990_s0 = inlined_call_operand.vmem [shape: s32[144,1], index: 0, kind: input, shape index: {}]   ;;  %s1991_s1 = inlined_call_operand.vmem [shape: s32[144,1], index: 1, kind: input, shape index: {}]   ;;  %s1992_s2 = inlined_call_operand.vmem [shape: f32[144,1], index: 2, kind: input, shape index: {}]   ;;  %s1993_s3 = inlined_call_operand.vmem [shape: bf16[64,128], index: 3, kind: input, shape index: {}]   ;;  %s1994_s4 = inlined_call_operand.vmem [shape: bf16[64,128], index: 4, kind: input, shape index: {}]   ;;  %s1995_s5 = inlined_call_operand.hbm [shape: f32[1,1], index: 5, kind: output, shape index: {}]  }
   0x1   :  { %v46_v0 = vld [vmem:[%s1991_s1] sm:$0xff]  ;;  %1230 = vset.pattern.permute.xlu1 %v1335_v2  ;;  %1229 = vset.pattern.permute.xlu0 %v1335_v2  ;;  %v47_v3 = vld [vmem:[%s1991_s1 + $0x8] sm:$0xff]  ;;  %v31_v6 = vld [vmem:[%s1990_s0 + $0x18] sm:$0xff] }
   0x2   :  { %v28_v1 = vld [vmem:[%s1990_s0] sm:$0xff]  ;;  %184 = vperm.xlu1 %1230, %v46_v0   ;;  %v29_v4 = vld [vmem:[%s1990_s0 + $0x8] sm:$0xff]  ;;  %1137 = vmatprep.subr.bf16.mxu0 %v1336_v5  ;;  %v30_v7 = vld [vmem:[%s1990_s0 + $0x10] sm:$0xff] }
   0x3   :  { %67 = vperm.xlu0 %1229, %v28_v1   ;;  %1181 = vmatprep.subr.bf16.mxu1 %v1336_v5  ;;  %v49_v8 = vld [vmem:[%s1991_s1 + $0x18] sm:$0xff]  ;;  %v48_v9 = vld [vmem:[%s1991_s1 + $0x10] sm:$0xff]  ;;  %v1231_v10 = vld [vmem:[%s1993_s3] sm:$0xff]  }
   0x4   :  { %1145 = vmatprep.mubr.msk.bf16.mxu0 %vm1337_vm0, %v1336_v5  ;;  %1189 = vmatprep.mubr.msk.bf16.mxu1 %vm1337_vm0, %v1336_v5  ;;  %v33_v11 = vld [vmem:[%s1990_s0 + $0x28] sm:$0xff]  ;;  %v32_v12 = vld [vmem:[%s1990_s0 + $0x20] sm:$0xff]  ;;  %v1235_v18 = vld [vmem:[%s1993_s3 + $0x10] sm:$0xff]  }
   0x5   :  { %v1232_v13 = vld [vmem:[%s1994_s4] sm:$0xff]   ;;  %v1233_v14 = vld [vmem:[%s1993_s3 + $0x8] sm:$0xff]   ;;  %1138 = vmatpush3.bf16.msra.mxu0 %v1231_v10  ;;  %v1236_v19 = vld [vmem:[%s1994_s4 + $0x10] sm:$0xff]  }
   0x6   :  { %187 = vperm.xlu1 %1230, %v47_v3   ;;  %1182 = vmatpush3.bf16.msra.mxu1 %v1232_v13  ;;  %v1234_v15 = vld [vmem:[%s1994_s4 + $0x8] sm:$0xff]   ;;  %v50_v17 = vld [vmem:[%s1991_s1 + $0x20] sm:$0xff] }
   0x7   :  { %70 = vperm.xlu0 %1229, %v29_v4   ;;  %1139 = vmatprep.subr.bf16.mxu0 %v1336_v5  ;;  %v51_v16 = vld [vmem:[%s1991_s1 + $0x28] sm:$0xff] }
   0x8   :  { %1183 = vmatprep.subr.bf16.mxu1 %v1336_v5 }
   0x9   :  { %1140 = vmatpush3.bf16.msra.mxu0 %v1233_v14 }
   0xa   :  { %76 = vperm.xlu1 %1230, %v31_v6   ;;  %1184 = vmatpush3.bf16.msra.mxu1 %v1234_v15 }
   0xb   :  { %73 = vperm.xlu0 %1229, %v30_v7   ;;  %1141 = vmatprep.subr.bf16.mxu0 %v1336_v5 }
   0xc   :  { %1185 = vmatprep.subr.bf16.mxu1 %v1336_v5 }
   0xe   :  { %193 = vperm.xlu1 %1230, %v49_v8  }
   0xf   :  { %190 = vperm.xlu0 %1229, %v48_v9  }
  0x12   :  { %82 = vperm.xlu1 %1230, %v33_v11  }
  0x13   :  { %79 = vperm.xlu0 %1229, %v32_v12  }
  0x14   :  { %10 = vsyncpa [#allocation3], 0  ;;  %v35_v20 = vld [vmem:[%s1990_s0 + $0x38] sm:$0xff]  ;;  %v34_v21 = vld [vmem:[%s1990_s0 + $0x30] sm:$0xff]  ;;  %1142 = vmatpush3.bf16.msra.mxu0 %v1235_v18  ;;  %1186 = vmatpush3.bf16.msra.mxu1 %v1236_v19  ;;  %v64_v46 = vlaneseq  ;;  %vm332_vm5 = vcmask 523264  }
  0x15   :  { %v1237_v22 = vld [vmem:[%s1993_s3 + $0x18] sm:$0xff]   ;;  %1143 = vmatprep.subr.bf16.mxu0 %v1336_v5  ;;  %1187 = vmatprep.subr.bf16.mxu1 %v1336_v5  ;;  %v52_v25 = vld [vmem:[%s1991_s1 + $0x30] sm:$0xff]  ;;  %v37_v26 = vld [vmem:[%s1990_s0 + $0x48] sm:$0xff] }
  0x16   :  { %199 = vperm.xlu1 %1230, %v51_v16   ;;  %v1238_v23 = vld [vmem:[%s1994_s4 + $0x18] sm:$0xff]   ;;  %v36_v27 = vld [vmem:[%s1990_s0 + $0x40] sm:$0xff]  ;;  %v55_v28 = vld [vmem:[%s1991_s1 + $0x48] sm:$0xff]  ;;  %v1513_v47 = vand.u32 127, %v64_v46 }
  0x17   :  { %196 = vperm.xlu0 %1229, %v50_v17   ;;  %v53_v24 = vld [vmem:[%s1991_s1 + $0x38] sm:$0xff]  ;;  %v54_v29 = vld [vmem:[%s1991_s1 + $0x40] sm:$0xff]  ;;  %v38_v31 = vld [vmem:[%s1990_s0 + $0x50] sm:$0xff] }
  0x18   :  { %1144 = vmatpush3.bf16.msra.mxu0 %v1237_v22  ;;  %1188 = vmatpush3.bf16.msra.mxu1 %v1238_v23  ;;  %v39_v30 = vld [vmem:[%s1990_s0 + $0x58] sm:$0xff]  ;;  %v56_v33 = vld [vmem:[%s1991_s1 + $0x50] sm:$0xff]  ;;  %v41_v34 = vld [vmem:[%s1990_s0 + $0x68] sm:$0xff] }
  0x19   :  { %v57_v32 = vld [vmem:[%s1991_s1 + $0x58] sm:$0xff]  ;;  %v40_v35 = vld [vmem:[%s1990_s0 + $0x60] sm:$0xff]  ;;  %v59_v36 = vld [vmem:[%s1991_s1 + $0x68] sm:$0xff] }
  0x1a   :  { %88 = vperm.xlu1 %1230, %v35_v20   ;;  %v58_v37 = vld [vmem:[%s1991_s1 + $0x60] sm:$0xff]  ;;  %v43_v38 = vld [vmem:[%s1990_s0 + $0x78] sm:$0xff]  ;;  %v42_v39 = vld [vmem:[%s1990_s0 + $0x70] sm:$0xff] }
  0x1b   :  { %85 = vperm.xlu0 %1229, %v34_v21   ;;  %v61_v40 = vld [vmem:[%s1991_s1 + $0x78] sm:$0xff]  ;;  %v60_v41 = vld [vmem:[%s1991_s1 + $0x70] sm:$0xff]  ;;  %v45_v42 = vld [vmem:[%s1990_s0 + $0x88] sm:$0xff] }
  0x1c   :  { %v44_v43 = vld [vmem:[%s1990_s0 + $0x80] sm:$0xff]  ;;  %v63_v44 = vld [vmem:[%s1991_s1 + $0x88] sm:$0xff] }
  0x1d   :  { %v62_v45 = vld [vmem:[%s1991_s1 + $0x80] sm:$0xff] }
  0x1e   :  { %205 = vperm.xlu1 %1230, %v53_v24  }
  0x1f   :  { %202 = vperm.xlu0 %1229, %v52_v25  }
  0x22   :  { %94 = vperm.xlu1 %1230, %v37_v26  }
  0x23   :  { %91 = vperm.xlu0 %1229, %v36_v27  }
  0x26   :  { %211 = vperm.xlu1 %1230, %v55_v28  }
  0x27   :  { %208 = vperm.xlu0 %1229, %v54_v29  }
  0x2a   :  { %100 = vperm.xlu1 %1230, %v39_v30  }
  0x2b   :  { %97 = vperm.xlu0 %1229, %v38_v31  }
  0x2e   :  { %217 = vperm.xlu1 %1230, %v57_v32  }
  0x2f   :  { %214 = vperm.xlu0 %1229, %v56_v33  }
  0x32   :  { %106 = vperm.xlu1 %1230, %v41_v34  }
  0x33   :  { %103 = vperm.xlu0 %1229, %v40_v35  }
  0x36   :  { %223 = vperm.xlu1 %1230, %v59_v36  }
  0x37   :  { %220 = vperm.xlu0 %1229, %v58_v37  }
  0x3a   :  { %112 = vperm.xlu1 %1230, %v43_v38  }
  0x3b   :  { %109 = vperm.xlu0 %1229, %v42_v39  }
  0x3e   :  { %229 = vperm.xlu1 %1230, %v61_v40  }
  0x3f   :  { %226 = vperm.xlu0 %1229, %v60_v41  }
  0x42   :  { %118 = vperm.xlu1 %1230, %v45_v42  }
  0x43   :  { %115 = vperm.xlu0 %1229, %v44_v43  }
  0x46   :  { %235 = vperm.xlu1 %1230, %v63_v44  }
  0x47   :  { %232 = vperm.xlu0 %1229, %v62_v45  }
  0x81   :  { %v185_v48 = vpop.permute.xlu1 %184 }
  0x82   :  { %v68_v49 = vpop.permute.xlu0 %67  ;;  %vm237_vm1 = vcmp.eq.s32.totalorder %v1513_v47, %v185_v48 }
  0x83   :  { %vm120_vm2 = vcmp.eq.s32.totalorder %v1513_v47, %v68_v49  ;;  %v1067_v52 = vsel %vm237_vm1, 1.0, %v1336_v5 }
  0x84   :  { %v1049_v53 = vsel %vm120_vm2, 1.0, %v1336_v5 }
  0x85   :  { %v188_v50 = vpop.permute.xlu1 %187 }
  0x86   :  { %v71_v51 = vpop.permute.xlu0 %70  ;;  %vm238_vm3 = vcmp.eq.s32.totalorder %v1513_v47, %v188_v50 }
  0x87   :  { %vm121_vm4 = vcmp.eq.s32.totalorder %v1513_v47, %v71_v51  ;;  %v1068_v54 = vsel %vm238_vm3, 1.0, %v1336_v5 }
  0x88   :  { %v1050_v55 = vsel %vm121_vm4, 1.0, %v1336_v5  ;;  %v291_v56 = vpack.c.bf16 %v1068_v54, %v1067_v52 }
  0x89   :  { %v174_v57 = vpack.c.bf16 %v1050_v55, %v1049_v53  ;;  %v77_v58 = vpop.permute.xlu1 %76 }
  0x8a   :  { %v74_v59 = vpop.permute.xlu0 %73  ;;  %vm123_vm6 = vcmp.eq.s32.totalorder %v1513_v47, %v77_v58  ;;  %1190 = vmatmul.mubr.msk.bf16.vlgmr.msra.gmra.mrb[0].mxu1 %vm332_vm5, %v291_v56 }
  0x8b   :  { %vm122_vm7 = vcmp.eq.s32.totalorder %v1513_v47, %v74_v59  ;;  %1146 = vmatmul.mubr.msk.bf16.vlgmr.msra.gmra.mrb[0].mxu0 %vm332_vm5, %v174_v57  ;;  %1193 = vmatprep.mubr.msk.bf16.mxu1 %vm1337_vm0, %v1336_v5  ;;  %v1052_v60 = vsel %vm123_vm6, 1.0, %v1336_v5 }
  0x8c   :  { %1149 = vmatprep.mubr.msk.bf16.mxu0 %vm1337_vm0, %v1336_v5  ;;  %v1051_v61 = vsel %vm122_vm7, 1.0, %v1336_v5 }
  0x8d   :  { %v194_v62 = vpop.permute.xlu1 %193  ;;  %v175_v2 = vpack.c.bf16 %v1052_v60, %v1051_v61 }
  0x8e   :  { %v191_v63 = vpop.permute.xlu0 %190  ;;  %vm240_vm8 = vcmp.eq.s32.totalorder %v1513_v47, %v194_v62 }
  0x8f   :  { %vm239_vm9 = vcmp.eq.s32.totalorder %v1513_v47, %v191_v63  ;;  %v1070_v0 = vsel %vm240_vm8, 1.0, %v1336_v5 }
  0x90   :  { %v1069_v1 = vsel %vm239_vm9, 1.0, %v1336_v5 }
  0x91   :  { %v292_v3 = vpack.c.bf16 %v1070_v0, %v1069_v1  ;;  %v83_v4 = vpop.permute.xlu1 %82 }
  0x92   :  { %v80_v6 = vpop.permute.xlu0 %79  ;;  %vm125_vm10 = vcmp.eq.s32.totalorder %v1513_v47, %v83_v4 }
  0x93   :  { %vm124_vm11 = vcmp.eq.s32.totalorder %v1513_v47, %v80_v6  ;;  %1150 = vmatmul.mubr.msk.bf16.gmra.mrb[4].mxu0 %vm332_vm5, %v175_v2  ;;  %1194 = vmatmul.mubr.msk.bf16.gmra.mrb[4].mxu1 %vm332_vm5, %v292_v3  ;;  %v1054_v7 = vsel %vm125_vm10, 1.0, %v1336_v5 }
  0x94   :  { %1153 = vmatprep.mubr.msk.bf16.mxu0 %vm1337_vm0, %v1336_v5  ;;  %1197 = vmatprep.mubr.msk.bf16.mxu1 %vm1337_vm0, %v1336_v5  ;;  %v1053_v8 = vsel %vm124_vm11, 1.0, %v1336_v5 }
  0x95   :  { %v200_v9 = vpop.permute.xlu1 %199  ;;  %v176_v13 = vpack.c.bf16 %v1054_v7, %v1053_v8 }
  0x96   :  { %v197_v10 = vpop.permute.xlu0 %196  ;;  %vm242_vm12 = vcmp.eq.s32.totalorder %v1513_v47, %v200_v9 }
  0x97   :  { %vm241_vm13 = vcmp.eq.s32.totalorder %v1513_v47, %v197_v10  ;;  %v1072_v11 = vsel %vm242_vm12, 1.0, %v1336_v5 }
  0x98   :  { %v1071_v12 = vsel %vm241_vm13, 1.0, %v1336_v5 }
  0x99   :  { %v293_v14 = vpack.c.bf16 %v1072_v11, %v1071_v12  ;;  %v89_v15 = vpop.permute.xlu1 %88 }
  0x9a   :  { %v86_v16 = vpop.permute.xlu0 %85  ;;  %vm127_vm14 = vcmp.eq.s32.totalorder %v1513_v47, %v89_v15 }
  0x9b   :  { %vm126_vm15 = vcmp.eq.s32.totalorder %v1513_v47, %v86_v16  ;;  %1154 = vmatmul.mubr.msk.bf16.gmra.mrb[8].mxu0 %vm332_vm5, %v176_v13  ;;  %1198 = vmatmul.mubr.msk.bf16.gmra.mrb[8].mxu1 %vm332_vm5, %v293_v14  ;;  %v1056_v17 = vsel %vm127_vm14, 1.0, %v1336_v5 }
  0x9c   :  { %1157 = vmatprep.mubr.msk.bf16.mxu0 %vm1337_vm0, %v1336_v5  ;;  %1201 = vmatprep.mubr.msk.bf16.mxu1 %vm1337_vm0, %v1336_v5  ;;  %v1055_v18 = vsel %vm126_vm15, 1.0, %v1336_v5 }
  0x9d   :  { %v206_v19 = vpop.permute.xlu1 %205  ;;  %v177_v23 = vpack.c.bf16 %v1056_v17, %v1055_v18 }
  0x9e   :  { %v203_v20 = vpop.permute.xlu0 %202  ;;  %vm244_vm1 = vcmp.eq.s32.totalorder %v1513_v47, %v206_v19 }
  0x9f   :  { %vm243_vm2 = vcmp.eq.s32.totalorder %v1513_v47, %v203_v20  ;;  %v1074_v21 = vsel %vm244_vm1, 1.0, %v1336_v5 }
  0xa0   :  { %v1073_v22 = vsel %vm243_vm2, 1.0, %v1336_v5 }
  0xa1   :  { %v294_v24 = vpack.c.bf16 %v1074_v21, %v1073_v22  ;;  %v95_v25 = vpop.permute.xlu1 %94 }
  0xa2   :  { %v92_v26 = vpop.permute.xlu0 %91  ;;  %vm129_vm3 = vcmp.eq.s32.totalorder %v1513_v47, %v95_v25 }
  0xa3   :  { %vm128_vm4 = vcmp.eq.s32.totalorder %v1513_v47, %v92_v26  ;;  %1158 = vmatmul.mubr.msk.bf16.gmra.mrb[12].mxu0 %vm332_vm5, %v177_v23  ;;  %1202 = vmatmul.mubr.msk.bf16.gmra.mrb[12].mxu1 %vm332_vm5, %v294_v24  ;;  %v1058_v27 = vsel %vm129_vm3, 1.0, %v1336_v5 }
  0xa4   :  { %1161 = vmatprep.mubr.msk.bf16.mxu0 %vm1337_vm0, %v1336_v5  ;;  %1205 = vmatprep.mubr.msk.bf16.mxu1 %vm1337_vm0, %v1336_v5  ;;  %v1057_v28 = vsel %vm128_vm4, 1.0, %v1336_v5 }
  0xa5   :  { %v212_v29 = vpop.permute.xlu1 %211  ;;  %v178_v33 = vpack.c.bf16 %v1058_v27, %v1057_v28 }
  0xa6   :  { %v209_v30 = vpop.permute.xlu0 %208  ;;  %vm246_vm6 = vcmp.eq.s32.totalorder %v1513_v47, %v212_v29 }
  0xa7   :  { %vm245_vm7 = vcmp.eq.s32.totalorder %v1513_v47, %v209_v30  ;;  %v1076_v31 = vsel %vm246_vm6, 1.0, %v1336_v5 }
  0xa8   :  { %v1075_v32 = vsel %vm245_vm7, 1.0, %v1336_v5 }
  0xa9   :  { %v295_v34 = vpack.c.bf16 %v1076_v31, %v1075_v32  ;;  %v101_v35 = vpop.permute.xlu1 %100 }
  0xaa   :  { %v98_v36 = vpop.permute.xlu0 %97  ;;  %vm131_vm8 = vcmp.eq.s32.totalorder %v1513_v47, %v101_v35 }
  0xab   :  { %vm130_vm9 = vcmp.eq.s32.totalorder %v1513_v47, %v98_v36  ;;  %1162 = vmatmul.mubr.msk.bf16.gmra.mrb[16].mxu0 %vm332_vm5, %v178_v33  ;;  %1206 = vmatmul.mubr.msk.bf16.gmra.mrb[16].mxu1 %vm332_vm5, %v295_v34  ;;  %v1060_v37 = vsel %vm131_vm8, 1.0, %v1336_v5 }
  0xac   :  { %1165 = vmatprep.mubr.msk.bf16.mxu0 %vm1337_vm0, %v1336_v5  ;;  %1209 = vmatprep.mubr.msk.bf16.mxu1 %vm1337_vm0, %v1336_v5  ;;  %v1059_v38 = vsel %vm130_vm9, 1.0, %v1336_v5 }
  0xad   :  { %v218_v39 = vpop.permute.xlu1 %217  ;;  %v179_v43 = vpack.c.bf16 %v1060_v37, %v1059_v38 }
  0xae   :  { %v215_v40 = vpop.permute.xlu0 %214  ;;  %vm248_vm10 = vcmp.eq.s32.totalorder %v1513_v47, %v218_v39 }
  0xaf   :  { %vm247_vm11 = vcmp.eq.s32.totalorder %v1513_v47, %v215_v40  ;;  %v1078_v41 = vsel %vm248_vm10, 1.0, %v1336_v5  ;;  %vm990_vm10 = vcmask 7168  }
  0xb0   :  { %v1077_v42 = vsel %vm247_vm11, 1.0, %v1336_v5 }
  0xb1   :  { %v296_v44 = vpack.c.bf16 %v1078_v41, %v1077_v42  ;;  %v107_v45 = vpop.permute.xlu1 %106 }
  0xb2   :  { %v104_v46 = vpop.permute.xlu0 %103  ;;  %vm133_vm12 = vcmp.eq.s32.totalorder %v1513_v47, %v107_v45 }
  0xb3   :  { %vm132_vm13 = vcmp.eq.s32.totalorder %v1513_v47, %v104_v46  ;;  %1166 = vmatmul.mubr.msk.bf16.gmra.mrb[20].mxu0 %vm332_vm5, %v179_v43  ;;  %1210 = vmatmul.mubr.msk.bf16.gmra.mrb[20].mxu1 %vm332_vm5, %v296_v44  ;;  %v1062_v48 = vsel %vm133_vm12, 1.0, %v1336_v5 }
  0xb4   :  { %1169 = vmatprep.mubr.msk.bf16.mxu0 %vm1337_vm0, %v1336_v5  ;;  %1213 = vmatprep.mubr.msk.bf16.mxu1 %vm1337_vm0, %v1336_v5  ;;  %v1061_v49 = vsel %vm132_vm13, 1.0, %v1336_v5 }
  0xb5   :  { %v224_v50 = vpop.permute.xlu1 %223  ;;  %v180_v54 = vpack.c.bf16 %v1062_v48, %v1061_v49 }
  0xb6   :  { %v221_v51 = vpop.permute.xlu0 %220  ;;  %vm250_vm14 = vcmp.eq.s32.totalorder %v1513_v47, %v224_v50 }
  0xb7   :  { %vm249_vm15 = vcmp.eq.s32.totalorder %v1513_v47, %v221_v51  ;;  %v1080_v52 = vsel %vm250_vm14, 1.0, %v1336_v5 }
  0xb8   :  { %v1079_v53 = vsel %vm249_vm15, 1.0, %v1336_v5 }
  0xb9   :  { %v297_v55 = vpack.c.bf16 %v1080_v52, %v1079_v53  ;;  %v113_v56 = vpop.permute.xlu1 %112 }
  0xba   :  { %v110_v57 = vpop.permute.xlu0 %109  ;;  %vm135_vm1 = vcmp.eq.s32.totalorder %v1513_v47, %v113_v56 }
  0xbb   :  { %vm134_vm2 = vcmp.eq.s32.totalorder %v1513_v47, %v110_v57  ;;  %1170 = vmatmul.mubr.msk.bf16.gmra.mrb[24].mxu0 %vm332_vm5, %v180_v54  ;;  %1214 = vmatmul.mubr.msk.bf16.gmra.mrb[24].mxu1 %vm332_vm5, %v297_v55  ;;  %v1064_v58 = vsel %vm135_vm1, 1.0, %v1336_v5 }
  0xbc   :  { %1173 = vmatprep.mubr.msk.bf16.mxu0 %vm1337_vm0, %v1336_v5  ;;  %1217 = vmatprep.mubr.msk.bf16.mxu1 %vm1337_vm0, %v1336_v5  ;;  %v1063_v59 = vsel %vm134_vm2, 1.0, %v1336_v5 }
  0xbd   :  { %v230_v60 = vpop.permute.xlu1 %229  ;;  %v181_v0 = vpack.c.bf16 %v1064_v58, %v1063_v59 }
  0xbe   :  { %v227_v61 = vpop.permute.xlu0 %226  ;;  %vm252_vm3 = vcmp.eq.s32.totalorder %v1513_v47, %v230_v60 }
  0xbf   :  { %vm251_vm4 = vcmp.eq.s32.totalorder %v1513_v47, %v227_v61  ;;  %v1082_v62 = vsel %vm252_vm3, 1.0, %v1336_v5 }
  0xc0   :  { %v1081_v63 = vsel %vm251_vm4, 1.0, %v1336_v5 }
  0xc1   :  { %v298_v1 = vpack.c.bf16 %v1082_v62, %v1081_v63  ;;  %v119_v2 = vpop.permute.xlu1 %118 }
  0xc2   :  { %v116_v3 = vpop.permute.xlu0 %115  ;;  %vm137_vm6 = vcmp.eq.s32.totalorder %v1513_v47, %v119_v2 }
  0xc3   :  { %vm136_vm7 = vcmp.eq.s32.totalorder %v1513_v47, %v116_v3  ;;  %1174 = vmatmul.mubr.msk.bf16.gmra.mrb[28].mxu0 %vm332_vm5, %v181_v0  ;;  %1218 = vmatmul.mubr.msk.bf16.gmra.mrb[28].mxu1 %vm332_vm5, %v298_v1  ;;  %v1066_v4 = vsel %vm137_vm6, 1.0, %v1336_v5 }
  0xc4   :  { %1177 = vmatprep.mubr.msk.bf16.mxu0 %vm1337_vm0, %v1336_v5  ;;  %1221 = vmatprep.mubr.msk.bf16.mxu1 %vm1337_vm0, %v1336_v5  ;;  %v1065_v6 = vsel %vm136_vm7, 1.0, %v1336_v5  ;;  %vm26_vm0 = vcmask 0  }
  0xc5   :  { %v236_v7 = vpop.permute.xlu1 %235  ;;  %v182_v11 = vpack.c.bf16 %v1066_v4, %v1065_v6  ;;  %27 = vst.msk [vmem:[#allocation2] sm:$0x1] %vm26_vm0, %v1336_v5 }
  0xc6   :  { %v233_v8 = vpop.permute.xlu0 %232  ;;  %vm254_vm8 = vcmp.eq.s32.totalorder %v1513_v47, %v236_v7 }
  0xc7   :  { %vm253_vm9 = vcmp.eq.s32.totalorder %v1513_v47, %v233_v8  ;;  %v1084_v9 = vsel %vm254_vm8, 1.0, %v1336_v5 }
  0xc8   :  { %v1083_v10 = vsel %vm253_vm9, 1.0, %v1336_v5  ;;  %v685_v5 = vld [vmem:[%s1992_s2 + $0x10] sm:$0xff] }
  0xc9   :  { %v299_v12 = vpack.c.bf16 %v1084_v9, %v1083_v10 }
  0xcb   :  { %1178 = vmatmul.mubr.msk.bf16.gmra.mrb[32].mxu0 %vm332_vm5, %v182_v11  ;;  %1222 = vmatmul.mubr.msk.bf16.gmra.mrb[32].mxu1 %vm332_vm5, %v299_v12 }
 0x15d   :  { %v558_v14 = vpop.f32.mrb[0].mxu1 }
 0x15e   :  { %v394_v13 = vpop.f32.mrb[0].mxu0  ;;  %v1191_v17 = vpop.f32.mrb[1].mxu1 }
 0x15f   :  { %v629_v15 = vmul.f32 %v558_v14, %v394_v13  ;;  %v1147_v16 = vpop.f32.mrb[1].mxu0  ;;  %v561_v19 = vpop.f32.mrb[2].mxu1 }
 0x160   :  { %v397_v18 = vpop.f32.mrb[2].mxu0  ;;  %v1192_v21 = vpop.f32.mrb[3].mxu1 }
 0x161   :  { %v630_v20 = vmul.f32 %v561_v19, %v397_v18  ;;  %647 = vadd.xlane.f32.xlu0 %v629_v15  ;;  %v1148_v47 = vpop.f32.mrb[3].mxu0 }
 0x163   :  { %649 = vadd.xlane.f32.xlu1 %v630_v20 }
 0x166   :  { %v402_v22 = vpop.f32.mrb[4].mxu0  ;;  %v566_v23 = vpop.f32.mrb[4].mxu1 }
 0x167   :  { %v631_v24 = vmul.f32 %v566_v23, %v402_v22  ;;  %v1151_v25 = vpop.f32.mrb[5].mxu0  ;;  %v1195_v26 = vpop.f32.mrb[5].mxu1 }
 0x168   :  { %v405_v27 = vpop.f32.mrb[6].mxu0  ;;  %v569_v28 = vpop.f32.mrb[6].mxu1 }
 0x169   :  { %v632_v29 = vmul.f32 %v569_v28, %v405_v27  ;;  %v1196_v30 = vpop.f32.mrb[7].mxu1  ;;  %651 = vadd.xlane.f32.xlu0 %v631_v24  ;;  %v1152_v31 = vpop.f32.mrb[7].mxu0 }
 0x16d   :  { %653 = vadd.xlane.f32.xlu0 %v632_v29 }
 0x16e   :  { %v410_v32 = vpop.f32.mrb[8].mxu0  ;;  %v574_v33 = vpop.f32.mrb[8].mxu1 }
 0x16f   :  { %v633_v34 = vmul.f32 %v574_v33, %v410_v32  ;;  %v1155_v35 = vpop.f32.mrb[9].mxu0  ;;  %v1199_v36 = vpop.f32.mrb[9].mxu1 }
 0x170   :  { %v413_v37 = vpop.f32.mrb[10].mxu0  ;;  %v577_v38 = vpop.f32.mrb[10].mxu1 }
 0x171   :  { %v634_v39 = vmul.f32 %v577_v38, %v413_v37  ;;  %v1200_v40 = vpop.f32.mrb[11].mxu1  ;;  %655 = vadd.xlane.f32.xlu1 %v633_v34  ;;  %v1156_v41 = vpop.f32.mrb[11].mxu0 }
 0x172   :  { %v684_v41 = vld [vmem:[%s1992_s2 + $0x8] sm:$0xff] }
 0x173   :  { %657 = vadd.xlane.f32.xlu0 %v634_v39  ;;  %v683_v39 = vld [vmem:[%s1992_s2] sm:$0xff] }
 0x176   :  { %v418_v42 = vpop.f32.mrb[12].mxu0  ;;  %v582_v43 = vpop.f32.mrb[12].mxu1 }
 0x177   :  { %v635_v44 = vmul.f32 %v582_v43, %v418_v42  ;;  %v1159_v45 = vpop.f32.mrb[13].mxu0  ;;  %v1203_v46 = vpop.f32.mrb[13].mxu1 }
 0x178   :  { %v421_v48 = vpop.f32.mrb[14].mxu0  ;;  %v585_v49 = vpop.f32.mrb[14].mxu1 }
 0x179   :  { %v636_v50 = vmul.f32 %v585_v49, %v421_v48  ;;  %v1204_v51 = vpop.f32.mrb[15].mxu1  ;;  %659 = vadd.xlane.f32.xlu1 %v635_v44  ;;  %v1160_v52 = vpop.f32.mrb[15].mxu0 }
 0x17b   :  { %661 = vadd.xlane.f32.xlu0 %v636_v50 }
 0x17e   :  { %v426_v53 = vpop.f32.mrb[16].mxu0  ;;  %v590_v54 = vpop.f32.mrb[16].mxu1 }
 0x17f   :  { %v637_v55 = vmul.f32 %v590_v54, %v426_v53  ;;  %v1163_v56 = vpop.f32.mrb[17].mxu0  ;;  %v1207_v57 = vpop.f32.mrb[17].mxu1  ;;  %v686_v53 = vld [vmem:[%s1992_s2 + $0x18] sm:$0xff] }
 0x180   :  { %v429_v58 = vpop.f32.mrb[18].mxu0  ;;  %v593_v59 = vpop.f32.mrb[18].mxu1 }
 0x181   :  { %v638_v60 = vmul.f32 %v593_v59, %v429_v58  ;;  %v1208_v61 = vpop.f32.mrb[19].mxu1  ;;  %663 = vadd.xlane.f32.xlu1 %v637_v55  ;;  %v1164_v62 = vpop.f32.mrb[19].mxu0  ;;  %v687_v59 = vld [vmem:[%s1992_s2 + $0x20] sm:$0xff] }
 0x183   :  { %665 = vadd.xlane.f32.xlu0 %v638_v60 }
 0x186   :  { %v434_v63 = vpop.f32.mrb[20].mxu0  ;;  %v598_v0 = vpop.f32.mrb[20].mxu1 }
 0x187   :  { %v639_v1 = vmul.f32 %v598_v0, %v434_v63  ;;  %v1167_v2 = vpop.f32.mrb[21].mxu0  ;;  %v1211_v3 = vpop.f32.mrb[21].mxu1  ;;  %v688_v63 = vld [vmem:[%s1992_s2 + $0x28] sm:$0xff] }
 0x188   :  { %v437_v4 = vpop.f32.mrb[22].mxu0  ;;  %v601_v6 = vpop.f32.mrb[22].mxu1 }
 0x189   :  { %v640_v7 = vmul.f32 %v601_v6, %v437_v4  ;;  %v1212_v8 = vpop.f32.mrb[23].mxu1  ;;  %667 = vadd.xlane.f32.xlu1 %v639_v1  ;;  %v1168_v9 = vpop.f32.mrb[23].mxu0 }
 0x18a   :  { %v689_v9 = vld [vmem:[%s1992_s2 + $0x30] sm:$0xff] }
 0x18b   :  { %669 = vadd.xlane.f32.xlu0 %v640_v7 }
 0x18e   :  { %v442_v10 = vpop.f32.mrb[24].mxu0  ;;  %v606_v11 = vpop.f32.mrb[24].mxu1 }
 0x18f   :  { %v641_v12 = vmul.f32 %v606_v11, %v442_v10  ;;  %v1171_v13 = vpop.f32.mrb[25].mxu0  ;;  %v1215_v14 = vpop.f32.mrb[25].mxu1 }
 0x190   :  { %v445_v15 = vpop.f32.mrb[26].mxu0  ;;  %v609_v16 = vpop.f32.mrb[26].mxu1 }
 0x191   :  { %v642_v17 = vmul.f32 %v609_v16, %v445_v15  ;;  %v1216_v18 = vpop.f32.mrb[27].mxu1  ;;  %671 = vadd.xlane.f32.xlu1 %v641_v12  ;;  %v1172_v19 = vpop.f32.mrb[27].mxu0  ;;  %v690_v12 = vld [vmem:[%s1992_s2 + $0x38] sm:$0xff] }
 0x193   :  { %673 = vadd.xlane.f32.xlu0 %v642_v17 }
 0x196   :  { %v450_v20 = vpop.f32.mrb[28].mxu0  ;;  %v614_v21 = vpop.f32.mrb[28].mxu1 }
 0x197   :  { %v643_v47 = vmul.f32 %v614_v21, %v450_v20  ;;  %v1175_v22 = vpop.f32.mrb[29].mxu0  ;;  %v1219_v23 = vpop.f32.mrb[29].mxu1 }
 0x198   :  { %v453_v24 = vpop.f32.mrb[30].mxu0  ;;  %v617_v25 = vpop.f32.mrb[30].mxu1  ;;  %v691_v23 = vld [vmem:[%s1992_s2 + $0x40] sm:$0xff] }
 0x199   :  { %v644_v26 = vmul.f32 %v617_v25, %v453_v24  ;;  %v1220_v27 = vpop.f32.mrb[31].mxu1  ;;  %675 = vadd.xlane.f32.xlu1 %v643_v47  ;;  %v1176_v28 = vpop.f32.mrb[31].mxu0 }
 0x19b   :  { %677 = vadd.xlane.f32.xlu0 %v644_v26 }
 0x19e   :  { %v458_v29 = vpop.f32.mrb[32].mxu0  ;;  %v622_v30 = vpop.f32.mrb[32].mxu1 }
 0x19f   :  { %v645_v31 = vmul.f32 %v622_v30, %v458_v29  ;;  %v1179_v32 = vpop.f32.mrb[33].mxu0  ;;  %v1223_v33 = vpop.f32.mrb[33].mxu1 }
 0x1a0   :  { %v461_v34 = vpop.f32.mrb[34].mxu0  ;;  %v625_v35 = vpop.f32.mrb[34].mxu1 }
 0x1a1   :  { %v646_v36 = vmul.f32 %v625_v35, %v461_v34  ;;  %v1224_v37 = vpop.f32.mrb[35].mxu1  ;;  %679 = vadd.xlane.f32.xlu1 %v645_v31  ;;  %v1180_v38 = vpop.f32.mrb[35].mxu0  ;;  %v692_v35 = vld [vmem:[%s1992_s2 + $0x48] sm:$0xff] }
 0x1a3   :  { %681 = vadd.xlane.f32.xlu0 %v646_v36 }
 0x1ee   :  { %v648_v40 = vpop.xlane.xlu0 %647 }
 0x1ef   :  { %v1645_v42 = vmul.f32 %v683_v39, %v648_v40 }
 0x1f0   :  { %v650_v43 = vpop.xlane.xlu1 %649 }
 0x1f1   :  { %v737_v44 = vand.u32 2147483647, %v1645_v42  ;;  %v1648_v45 = vmul.f32 %v684_v41, %v650_v43  ;;  %v719_v39 = vmin.f32 %v1645_v42, 0.0  ;;  %v693_v41 = vld [vmem:[%s1992_s2 + $0x50] sm:$0xff] }
 0x1f3   :  { %v738_v46 = vand.u32 2147483647, %v1648_v45  ;;  %v755_v48 = vsub.f32 0.0, %v737_v44  ;;  %v720_v44 = vmin.f32 %v1648_v45, 0.0 }
 0x1f5   :  { %v756_v49 = vsub.f32 0.0, %v738_v46  ;;  %v773_v52 = vmul.f32 1.442695, %v755_v48 }
 0x1f6   :  { %v652_v50 = vpop.xlane.xlu0 %651 }
 0x1f7   :  { %v1654_v51 = vmul.f32 %v685_v5, %v652_v50  ;;  %v775_v54 = vmul.f32 1.442695, %v756_v49  ;;  %1239 = vpow2.f32 %v773_v52 }
 0x1f9   :  { %v739_v55 = vand.u32 2147483647, %v1654_v51  ;;  %1241 = vpow2.f32 %v775_v54  ;;  %v721_v46 = vmin.f32 %v1654_v51, 0.0 }
 0x1fa   :  { %v654_v56 = vpop.xlane.xlu0 %653 }
 0x1fb   :  { %v757_v57 = vsub.f32 0.0, %v739_v55  ;;  %v1660_v58 = vmul.f32 %v686_v53, %v654_v56 }
 0x1fd   :  { %v777_v60 = vmul.f32 1.442695, %v757_v57  ;;  %v740_v61 = vand.u32 2147483647, %v1660_v58  ;;  %v722_v54 = vmin.f32 %v1660_v58, 0.0 }
 0x1fe   :  { %v656_v62 = vpop.xlane.xlu1 %655 }
 0x1ff   :  { %v758_v0 = vsub.f32 0.0, %v740_v61  ;;  %v1669_v1 = vmul.f32 %v687_v59, %v656_v62  ;;  %1243 = vpow2.f32 %v777_v60  ;;  %v694_v60 = vld [vmem:[%s1992_s2 + $0x58] sm:$0xff] }
 0x200   :  { %v658_v2 = vpop.xlane.xlu0 %657 }
 0x201   :  { %v741_v3 = vand.u32 2147483647, %v1669_v1  ;;  %v1672_v4 = vmul.f32 %v688_v63, %v658_v2  ;;  %v779_v6 = vmul.f32 1.442695, %v758_v0  ;;  %v1678_v10 = vpop.eup %1239  ;;  %v723_v55 = vmin.f32 %v1669_v1, 0.0 }
 0x202   :  { %v809_v18 = vadd.f32 1.0, %v1678_v10  ;;  %v812_v32 = vmul.f32 -0.5, %v1678_v10  ;;  %v815_v33 = vand.u32 2147483647, %v1678_v10 }
 0x203   :  { %v759_v7 = vsub.f32 0.0, %v741_v3  ;;  %v742_v8 = vand.u32 2147483647, %v1672_v4  ;;  %v1683_v13 = vpop.eup %1241  ;;  %1245 = vpow2.f32 %v779_v6 }
 0x204   :  { %v818_v20 = vadd.f32 1.0, %v1683_v13  ;;  %v821_v37 = vmul.f32 -0.5, %v1683_v13  ;;  %v813_v52 = vadd.f32 1.0, %v812_v32  ;;  %vm1721_vm5 = vcmp.lt.f32.partialorder %v815_v33, 0.0004427343 }
 0x205   :  { %v781_v14 = vmul.f32 1.442695, %v759_v7  ;;  %v760_v15 = vsub.f32 0.0, %v742_v8  ;;  %v824_v62 = vand.u32 2147483647, %v1683_v13  ;;  %v724_v7 = vmin.f32 %v1672_v4, 0.0 }
 0x206   :  { %v660_v11 = vpop.xlane.xlu1 %659  ;;  %v822_v57 = vadd.f32 1.0, %v821_v37 }
 0x207   :  { %v1685_v16 = vmul.f32 %v689_v9, %v660_v11  ;;  %1247 = vpow2.f32 %v781_v14  ;;  %v783_v22 = vmul.f32 1.442695, %v760_v15  ;;  %v814_v15 = vmul.f32 %v1678_v10, %v813_v52 }
 0x208   :  { %v662_v17 = vpop.xlane.xlu0 %661  ;;  %1249 = vlog2.f32 %v809_v18  ;;  %vm1749_vm11 = vcmp.lt.f32.partialorder %v824_v62, 0.0004427343 }
 0x209   :  { %v1688_v19 = vmul.f32 %v690_v12, %v662_v17  ;;  %v1691_v21 = vpop.eup %1243  ;;  %v743_v47 = vand.u32 2147483647, %v1685_v16  ;;  %1251 = vlog2.f32 %v818_v20  ;;  %v823_v17 = vmul.f32 %v1683_v13, %v822_v57 }
 0x20a   :  { %v827_v26 = vadd.f32 1.0, %v1691_v21  ;;  %1253 = vpow2.f32 %v783_v22  ;;  %v830_v6 = vmul.f32 -0.5, %v1691_v21  ;;  %v833_v18 = vand.u32 2147483647, %v1691_v21 }
 0x20b   :  { %v761_v24 = vsub.f32 0.0, %v743_v47  ;;  %v744_v25 = vand.u32 2147483647, %v1688_v19  ;;  %v725_v13 = vmin.f32 %v1685_v16, 0.0 }
 0x20c   :  { %1255 = vlog2.f32 %v827_v26  ;;  %v831_v26 = vadd.f32 1.0, %v830_v6  ;;  %vm1765_vm12 = vcmp.lt.f32.partialorder %v833_v18, 0.0004427343 }
 0x20d   :  { %v785_v28 = vmul.f32 1.442695, %v761_v24  ;;  %v1701_v30 = vpop.eup %1245  ;;  %v762_v31 = vsub.f32 0.0, %v744_v25 }
 0x20e   :  { %v664_v27 = vpop.xlane.xlu1 %663  ;;  %v836_v38 = vadd.f32 1.0, %v1701_v30  ;;  %v839_v20 = vmul.f32 -0.5, %v1701_v30  ;;  %v842_v10 = vand.u32 2147483647, %v1701_v30  ;;  %v832_v53 = vmul.f32 %v1691_v21, %v831_v26 }
 0x20f   :  { %v1699_v29 = vmul.f32 %v691_v23, %v664_v27  ;;  %1257 = vpow2.f32 %v785_v28  ;;  %v787_v40 = vmul.f32 1.442695, %v762_v31 }
 0x210   :  { %v666_v36 = vpop.xlane.xlu0 %665  ;;  %1259 = vlog2.f32 %v836_v38  ;;  %vm1774_vm13 = vcmp.lt.f32.partialorder %v842_v10, 0.0004427343  ;;  %v698_v38 = vld [vmem:[%s1992_s2 + $0x78] sm:$0xff] }
 0x211   :  { %v745_v34 = vand.u32 2147483647, %v1699_v29  ;;  %v1715_v43 = vpop.eup %1247  ;;  %v1719_v5 = vmul.f32 %v692_v35, %v666_v36  ;;  %1261 = vpow2.f32 %v787_v40  ;;  %v695_v36 = vld [vmem:[%s1992_s2 + $0x60] sm:$0xff]  ;;  %v840_v40 = vadd.f32 1.0, %v839_v20  ;;  %v700_v20 = vld [vmem:[%s1992_s2 + $0x88] sm:$0xff] }
 0x212   :  { %v1250_v50 = vpop.eup %1249  ;;  %v845_v63 = vadd.f32 1.0, %v1715_v43  ;;  %v848_v31 = vmul.f32 -0.5, %v1715_v43 }
 0x213   :  { %v763_v48 = vsub.f32 0.0, %v745_v34  ;;  %v1252_v56 = vpop.eup %1251  ;;  %v746_v0 = vand.u32 2147483647, %v1719_v5  ;;  %v811_v3 = vmul.f32 0.6931472, %v1250_v50  ;;  %v841_v6 = vmul.f32 %v1701_v30, %v840_v40 }
 0x214   :  { %v1735_v2 = vpop.eup %1253  ;;  %v820_v9 = vmul.f32 0.6931472, %v1252_v56 }
 0x215   :  { %v789_v45 = vmul.f32 1.442695, %v763_v48  ;;  %v764_v11 = vsub.f32 0.0, %v746_v0  ;;  %v854_v22 = vadd.f32 1.0, %v1735_v2  ;;  %v817_v27 = vsel %vm1721_vm5, %v814_v15, %v811_v3  ;;  %v696_v48 = vld [vmem:[%s1992_s2 + $0x68] sm:$0xff] }
 0x216   :  { %v668_v49 = vpop.xlane.xlu1 %667  ;;  %v1256_v14 = vpop.eup %1255  ;;  %v826_v28 = vsel %vm1749_vm11, %v823_v17, %v820_v9  ;;  %v857_v42 = vmul.f32 -0.5, %v1735_v2  ;;  %v860_v9 = vand.u32 2147483647, %v1735_v2 }
 0x217   :  { %v1727_v59 = vmul.f32 %v693_v41, %v668_v49  ;;  %1263 = vpow2.f32 %v789_v45  ;;  %v791_v23 = vmul.f32 1.442695, %v764_v11  ;;  %v829_v33 = vmul.f32 0.6931472, %v1256_v14 }
 0x218   :  { %v670_v61 = vpop.xlane.xlu0 %669  ;;  %1265 = vlog2.f32 %v845_v63  ;;  %v726_v41 = vmin.f32 %v1688_v19, 0.0  ;;  %v972_v52 = vsub.f32 %v720_v44, %v826_v28  ;;  %v971_v45 = vsub.f32 %v719_v39, %v817_v27 }
 0x219   :  { %v747_v8 = vand.u32 2147483647, %v1727_v59  ;;  %v1740_v12 = vmul.f32 %v694_v60, %v670_v61  ;;  %v1746_v47 = vpop.eup %1257  ;;  %1267 = vpow2.f32 %v791_v23  ;;  %v851_v60 = vand.u32 2147483647, %v1715_v43 }
 0x21a   :  { %v863_v34 = vadd.f32 1.0, %v1746_v47  ;;  %1269 = vlog2.f32 %v854_v22  ;;  %v1260_v50 = vpop.eup %1259  ;;  %v835_v44 = vsel %vm1765_vm12, %v832_v53, %v829_v33  ;;  %v849_v63 = vadd.f32 1.0, %v848_v31  ;;  %v697_v31 = vld [vmem:[%s1992_s2 + $0x70] sm:$0xff] }
 0x21b   :  { %v765_v24 = vsub.f32 0.0, %v747_v8  ;;  %v748_v32 = vand.u32 2147483647, %v1740_v12  ;;  %v1778_v57 = vpop.eup %1261  ;;  %v838_v3 = vmul.f32 0.6931472, %v1260_v50  ;;  %v727_v39 = vmin.f32 %v1699_v29, 0.0 }
 0x21c   :  { %v992_v8 = vsel %vm990_vm10, %v972_v52, 0.0  ;;  %v872_v11 = vadd.f32 1.0, %v1778_v57  ;;  %v991_v17 = vsel %vm990_vm10, %v971_v45, 0.0  ;;  %v973_v18 = vsub.f32 %v721_v46, %v835_v44 }
 0x21d   :  { %v793_v35 = vmul.f32 1.442695, %v765_v24  ;;  %v766_v61 = vsub.f32 0.0, %v748_v32  ;;  %vm1800_vm14 = vcmp.lt.f32.partialorder %v851_v60, 0.0004427343  ;;  %v850_v22 = vmul.f32 %v1715_v43, %v849_v63 }
 0x21e   :  { %v672_v37 = vpop.xlane.xlu1 %671  ;;  %v993_v25 = vadd.f32 %v992_v8, %v991_v17  ;;  %v844_v26 = vsel %vm1774_vm13, %v841_v6, %v838_v3  ;;  %v858_v10 = vadd.f32 1.0, %v857_v42  ;;  %vm1812_vm15 = vcmp.lt.f32.partialorder %v860_v9, 0.0004427343  ;;  %v699_v17 = vld [vmem:[%s1992_s2 + $0x80] sm:$0xff]  ;;  %s1338_s2 = smov [#allocation2]  }
 0x21f   :  { %1271 = vpow2.f32 %v793_v35  ;;  %v1783_v62 = vmul.f32 %v695_v36, %v672_v37  ;;  %v795_v14 = vmul.f32 1.442695, %v766_v61  ;;  %v866_v35 = vmul.f32 -0.5, %v1746_v47  ;;  %s1041_s7 = sshll.u32 %s1338_s2, 4  ;;  %s1042_s7 = int_to_ptr.vmem [resolvable:$true] %s1041_s7 }
 0x220   :  { %v674_v49 = vpop.xlane.xlu0 %673  ;;  %1273 = vlog2.f32 %v863_v34  ;;  %v994_v34 = vsel %vm990_vm10, %v973_v18, 0.0  ;;  %v728_v36 = vmin.f32 %v1719_v5, 0.0  ;;  %v869_v50 = vand.u32 2147483647, %v1746_v47  ;;  %s1311_s8 = scalar_lea.vmem %s1042_s7, 16  ;;  %s1315_s9 = scalar_lea.vmem %s1042_s7, 32 }
 0x221   :  { %v1787_v21 = vmul.f32 %v696_v48, %v674_v49  ;;  %v1789_v0 = vpop.eup %1263  ;;  %v749_v30 = vand.u32 2147483647, %v1783_v62  ;;  %1275 = vpow2.f32 %v795_v14  ;;  %v974_v49 = vsub.f32 %v722_v54, %v844_v26  ;;  %p1312_p0 = scmp.ne.s32.totalorder %s1042_s7, %s1311_s8  ;;  %p1316_p1 = scmp.lt.s32.totalorder %s1042_s7, %s1042_s7 }
 0x222   :  { %v1266_v15 = vpop.eup %1265  ;;  %v881_v23 = vadd.f32 1.0, %v1789_v0  ;;  %1277 = vlog2.f32 %v872_v11  ;;  %v859_v53 = vmul.f32 %v1735_v2, %v858_v10  ;;  %v729_v56 = vmin.f32 %v1727_v59, 0.0  ;;  %p1317_p2 = scmp.lt.s32.totalorder %s1315_s9, %s1311_s8 }
 0x223   :  { %v750_v24 = vand.u32 2147483647, %v1787_v21  ;;  %v767_v51 = vsub.f32 0.0, %v749_v30  ;;  %v1810_v46 = vpop.eup %1267  ;;  %v847_v27 = vmul.f32 0.6931472, %v1266_v15  ;;  %v995_v54 = vadd.f32 %v994_v34, %v993_v25 }
 0x224   :  { %v1270_v33 = vpop.eup %1269  ;;  %v890_v37 = vadd.f32 1.0, %v1810_v46  ;;  %1279 = vlog2.f32 %v881_v23  ;;  %v867_v6 = vadd.f32 1.0, %v866_v35  ;;  %v875_v42 = vmul.f32 -0.5, %v1778_v57  ;;  %p1318_p3 = por %p1317_p2, %p1316_p1 }
 0x225   :  { %v768_v43 = vsub.f32 0.0, %v750_v24  ;;  %v797_v52 = vmul.f32 1.442695, %v767_v51  ;;  %v853_v44 = vsel %vm1800_vm14, %v850_v22, %v847_v27  ;;  %v856_v63 = vmul.f32 0.6931472, %v1270_v33 }
 0x226   :  { %v676_v32 = vpop.xlane.xlu1 %675  ;;  %1281 = vlog2.f32 %v890_v37  ;;  %v996_v2 = vsel %vm990_vm10, %v974_v49, 0.0  ;;  %vm1842_vm1 = vcmp.lt.f32.partialorder %v869_v50, 0.0004427343  ;;  %v878_v9 = vand.u32 2147483647, %v1778_v57  ;;  %p1319_p4 = pnand %p1318_p3, %p1312_p0 }
 0x227   :  { %v799_v45 = vmul.f32 1.442695, %v768_v43  ;;  %v1833_v60 = vmul.f32 %v697_v31, %v676_v32  ;;  %1283 = vpow2.f32 %v797_v52  ;;  %v975_v11 = vsub.f32 %v723_v55, %v853_v44 }
 0x228   :  { %v678_v40 = vpop.xlane.xlu0 %677  ;;  %v862_v1 = vsel %vm1812_vm15, %v859_v53, %v856_v63  ;;  %v884_v55 = vmul.f32 -0.5, %v1789_v0  ;;  %v868_v24 = vmul.f32 %v1746_v47, %v867_v6  ;;  %v876_v25 = vadd.f32 1.0, %v875_v42 }
 0x229   :  { %v1826_v48 = vpop.eup %1271  ;;  %v1838_v58 = vmul.f32 %v698_v38, %v678_v40  ;;  %1285 = vpow2.f32 %v799_v45  ;;  %v751_v15 = vand.u32 2147483647, %v1833_v60  ;;  %vm1864_vm2 = vcmp.lt.f32.partialorder %v878_v9, 0.0004427343 }
 0x22a   :  { %v1274_v61 = vpop.eup %1273  ;;  %v899_v3 = vadd.f32 1.0, %v1826_v48  ;;  %v998_v32 = vsel %vm990_vm10, %v975_v11, 0.0  ;;  %v976_v33 = vsub.f32 %v724_v7, %v862_v1  ;;  %v887_v34 = vand.u32 2147483647, %v1789_v0 }
 0x22b   :  { %v865_v14 = vmul.f32 0.6931472, %v1274_v61  ;;  %v1856_v22 = vpop.eup %1275  ;;  %v752_v23 = vand.u32 2147483647, %v1838_v58  ;;  %v769_v10 = vsub.f32 0.0, %v751_v15  ;;  %v885_v37 = vadd.f32 1.0, %v884_v55 }
 0x22c   :  { %1287 = vlog2.f32 %v899_v3  ;;  %v908_v26 = vadd.f32 1.0, %v1856_v22  ;;  %v1278_v51 = vpop.eup %1277  ;;  %v997_v49 = vadd.f32 %v996_v2, %v995_v54  ;;  %v893_v52 = vmul.f32 -0.5, %v1810_v46 }
 0x22d   :  { %v770_v43 = vsub.f32 0.0, %v752_v23  ;;  %v871_v47 = vsel %vm1842_vm1, %v868_v24, %v865_v14  ;;  %v801_v38 = vmul.f32 1.442695, %v769_v10  ;;  %v874_v50 = vmul.f32 0.6931472, %v1278_v51 }
 0x22e   :  { %v680_v18 = vpop.xlane.xlu1 %679  ;;  %v1280_v35 = vpop.eup %1279  ;;  %1289 = vlog2.f32 %v908_v26  ;;  %v977_v4 = vsub.f32 %v725_v13, %v871_v47  ;;  %v902_v7 = vmul.f32 -0.5, %v1826_v48  ;;  %v999_v44 = vadd.f32 %v998_v32, %v997_v49 }
 0x22f   :  { %v1868_v31 = vmul.f32 %v699_v17, %v680_v18  ;;  %v803_v40 = vmul.f32 1.442695, %v770_v43  ;;  %1291 = vpow2.f32 %v801_v38  ;;  %v877_v63 = vmul.f32 %v1778_v57, %v876_v25 }
 0x230   :  { %v682_v30 = vpop.xlane.xlu0 %681  ;;  %v1282_v61 = vpop.eup %1281  ;;  %v883_v3 = vmul.f32 0.6931472, %v1280_v35  ;;  %v1000_v6 = vsel %vm990_vm10, %v976_v33, 0.0  ;;  %v886_v42 = vmul.f32 %v1789_v0, %v885_v37  ;;  %vm1889_vm3 = vcmp.lt.f32.partialorder %v887_v34, 0.0004427343 }
 0x231   :  { %v1870_v28 = vmul.f32 %v700_v20, %v682_v30  ;;  %v753_v53 = vand.u32 2147483647, %v1868_v31  ;;  %1293 = vpow2.f32 %v803_v40  ;;  %v1885_v54 = vpop.eup %1283  ;;  %v896_v13 = vand.u32 2147483647, %v1810_v46 }
 0x232   :  { %v880_v8 = vsel %vm1864_vm2, %v877_v63, %v874_v50  ;;  %v894_v57 = vadd.f32 1.0, %v893_v52  ;;  %v917_v9 = vadd.f32 1.0, %v1885_v54  ;;  %v1002_v15 = vsel %vm990_vm10, %v977_v4, 0.0 }
 0x233   :  { %v754_v45 = vand.u32 2147483647, %v1870_v28  ;;  %v1894_v2 = vpop.eup %1285  ;;  %v771_v11 = vsub.f32 0.0, %v753_v53  ;;  %v903_v17 = vadd.f32 1.0, %v902_v7  ;;  %v889_v20 = vsel %vm1889_vm3, %v886_v42, %v883_v3 }
 0x234   :  { %v926_v0 = vadd.f32 1.0, %v1894_v2  ;;  %v892_v30 = vmul.f32 0.6931472, %v1282_v61  ;;  %v911_v1 = vmul.f32 -0.5, %v1856_v22  ;;  %1295 = vlog2.f32 %v917_v9 }
 0x235   :  { %v772_v18 = vsub.f32 0.0, %v754_v45  ;;  %v1001_v55 = vadd.f32 %v1000_v6, %v999_v44  ;;  %v978_v23 = vsub.f32 %v726_v41, %v880_v8  ;;  %v905_v24 = vand.u32 2147483647, %v1826_v48 }
 0x236   :  { %v1288_v14 = vpop.eup %1287  ;;  %1297 = vlog2.f32 %v926_v0  ;;  %v895_v25 = vmul.f32 %v1810_v46, %v894_v57  ;;  %vm1908_vm4 = vcmp.lt.f32.partialorder %v896_v13, 0.0004427343  ;;  %v805_v51 = vmul.f32 1.442695, %v771_v11 }
 0x237   :  { %v901_v10 = vmul.f32 0.6931472, %v1288_v14  ;;  %v1003_v43 = vadd.f32 %v1002_v15, %v1001_v55  ;;  %v979_v32 = vsub.f32 %v727_v39, %v889_v20  ;;  %v920_v33 = vmul.f32 -0.5, %v1885_v54 }
 0x238   :  { %v1290_v27 = vpop.eup %1289  ;;  %v807_v19 = vmul.f32 1.442695, %v772_v18  ;;  %v898_v41 = vsel %vm1908_vm4, %v895_v25, %v892_v30  ;;  %v904_v47 = vmul.f32 %v1826_v48, %v903_v17  ;;  %v912_v46 = vadd.f32 1.0, %v911_v1 }
 0x239   :  { %1299 = vpow2.f32 %v805_v51  ;;  %v1918_v34 = vpop.eup %1291  ;;  %v1004_v35 = vsel %vm990_vm10, %v978_v23, 0.0  ;;  %vm1921_vm6 = vcmp.lt.f32.partialorder %v905_v24, 0.0004427343  ;;  %v914_v29 = vand.u32 2147483647, %v1856_v22 }
 0x23a   :  { %1301 = vpow2.f32 %v807_v19  ;;  %v907_v38 = vsel %vm1921_vm6, %v904_v47, %v901_v10  ;;  %v910_v40 = vmul.f32 0.6931472, %v1290_v27  ;;  %v929_v48 = vmul.f32 -0.5, %v1894_v2 }
 0x23b   :  { %v1926_v39 = vpop.eup %1293  ;;  %v935_v49 = vadd.f32 1.0, %v1918_v34  ;;  %v1006_v50 = vsel %vm990_vm10, %v979_v32, 0.0  ;;  %v980_v52 = vsub.f32 %v728_v36, %v898_v41  ;;  %v921_v53 = vadd.f32 1.0, %v920_v33 }
 0x23c   :  { %v944_v4 = vadd.f32 1.0, %v1926_v39  ;;  %v1005_v7 = vadd.f32 %v1004_v35, %v1003_v43  ;;  %v913_v45 = vmul.f32 %v1856_v22, %v912_v46  ;;  %v923_v61 = vand.u32 2147483647, %v1885_v54 }
 0x23d   :  { %1303 = vlog2.f32 %v935_v49  ;;  %v981_v44 = vsub.f32 %v729_v56, %v907_v38  ;;  %v730_v63 = vmin.f32 %v1740_v12, 0.0  ;;  %vm1941_vm7 = vcmp.lt.f32.partialorder %v914_v29, 0.0004427343 }
 0x23e   :  { %1305 = vlog2.f32 %v944_v4  ;;  %v1296_v5 = vpop.eup %1295  ;;  %v1007_v36 = vadd.f32 %v1006_v50, %v1005_v7  ;;  %v916_v6 = vsel %vm1941_vm7, %v913_v45, %v910_v40  ;;  %v930_v42 = vadd.f32 1.0, %v929_v48 }
 0x23f   :  { %v932_v22 = vand.u32 2147483647, %v1894_v2  ;;  %v1008_v13 = vsel %vm990_vm10, %v980_v52, 0.0  ;;  %v919_v59 = vmul.f32 0.6931472, %v1296_v5  ;;  %v922_v56 = vmul.f32 %v1885_v54, %v921_v53 }
 0x240   :  { %v1298_v16 = vpop.eup %1297  ;;  %v938_v12 = vmul.f32 -0.5, %v1918_v34  ;;  %vm924_vm8 = vcmp.lt.f32.partialorder %v923_v61, 0.0004427343  ;;  %v947_v57 = vmul.f32 -0.5, %v1926_v39  ;;  %v1010_v9 = vsel %vm990_vm10, %v981_v44, 0.0 }
 0x241   :  { %v928_v8 = vmul.f32 0.6931472, %v1298_v16  ;;  %v982_v11 = vsub.f32 %v730_v63, %v916_v6  ;;  %v731_v14 = vmin.f32 %v1783_v62, 0.0  ;;  %v925_v15 = vsel %vm924_vm8, %v922_v56, %v919_v59 }
 0x242   :  { %v1009_v0 = vadd.f32 %v1008_v13, %v1007_v36  ;;  %v931_v18 = vmul.f32 %v1894_v2, %v930_v42  ;;  %v941_v20 = vand.u32 2147483647, %v1918_v34  ;;  %vm1956_vm9 = vcmp.lt.f32.partialorder %v932_v22, 0.0004427343 }
 0x243   :  { %v1300_v17 = vpop.eup %1299  ;;  %v983_v54 = vsub.f32 %v731_v14, %v925_v15  ;;  %v939_v55 = vadd.f32 1.0, %v938_v12  ;;  %v948_v62 = vadd.f32 1.0, %v947_v57  ;;  %v1012_v10 = vsel %vm990_vm10, %v982_v11, 0.0 }
 0x244   :  { %v1302_v30 = vpop.eup %1301  ;;  %v953_v23 = vadd.f32 1.0, %v1300_v17  ;;  %v1011_v24 = vadd.f32 %v1010_v9, %v1009_v0  ;;  %v934_v25 = vsel %vm1956_vm9, %v931_v18, %v928_v8  ;;  %v732_v2 = vmin.f32 %v1787_v21, 0.0  ;;  %v989_v18 = vld [vmem:[#allocation2] sm:$0x1] }
 0x245   :  { %v962_v26 = vadd.f32 1.0, %v1302_v30  ;;  %v950_v51 = vand.u32 2147483647, %v1926_v39  ;;  %v733_v43 = vmin.f32 %v1833_v60, 0.0  ;;  %vm942_vm5 = vcmp.lt.f32.partialorder %v941_v20, 0.0004427343 }
 0x246   :  { %1307 = vlog2.f32 %v953_v23  ;;  %v1014_v33 = vsel %vm990_vm10, %v983_v54, 0.0  ;;  %v984_v19 = vsub.f32 %v732_v2, %v934_v25  ;;  %v940_v47 = vmul.f32 %v1918_v34, %v939_v55 }
 0x247   :  { %v1304_v27 = vpop.eup %1303  ;;  %1309 = vlog2.f32 %v962_v26  ;;  %v1013_v46 = vadd.f32 %v1012_v10, %v1011_v24  ;;  %v949_v37 = vmul.f32 %v1926_v39, %v948_v62  ;;  %v956_v21 = vmul.f32 -0.5, %v1300_v17 }
 0x248   :  { %v1306_v32 = vpop.eup %1305  ;;  %v937_v41 = vmul.f32 0.6931472, %v1304_v27  ;;  %vm951_vm11 = vcmp.lt.f32.partialorder %v950_v51, 0.0004427343  ;;  %v965_v38 = vmul.f32 -0.5, %v1302_v30  ;;  %v1016_v49 = vsel %vm990_vm10, %v984_v19, 0.0 }
 0x249   :  { %v946_v35 = vmul.f32 0.6931472, %v1306_v32  ;;  %v1015_v40 = vadd.f32 %v1014_v33, %v1013_v46  ;;  %v734_v50 = vmin.f32 %v1838_v58, 0.0  ;;  %v957_v52 = vadd.f32 1.0, %v956_v21 }
 0x24a   :  { %v943_v29 = vsel %vm942_vm5, %v940_v47, %v937_v41  ;;  %v959_v34 = vand.u32 2147483647, %v1300_v17  ;;  %v966_v7 = vadd.f32 1.0, %v965_v38  ;;  %v968_v61 = vand.u32 2147483647, %v1302_v30 }
 0x24b   :  { %v985_v48 = vsub.f32 %v733_v43, %v943_v29  ;;  %v952_v60 = vsel %vm951_vm11, %v949_v37, %v946_v35  ;;  %v1017_v45 = vadd.f32 %v1016_v49, %v1015_v40  ;;  %v735_v3 = vmin.f32 %v1868_v31, 0.0 }
 0x24c   :  { %v986_v4 = vsub.f32 %v734_v50, %v952_v60  ;;  %v958_v36 = vmul.f32 %v1300_v17, %v957_v52  ;;  %vm960_vm12 = vcmp.lt.f32.partialorder %v959_v34, 0.0004427343  ;;  %v967_v58 = vmul.f32 %v1302_v30, %v966_v7 }
 0x24d   :  { %v1018_v53 = vsel %vm990_vm10, %v985_v48, 0.0  ;;  %v736_v16 = vmin.f32 %v1870_v28, 0.0  ;;  %vm969_vm13 = vcmp.lt.f32.partialorder %v968_v61, 0.0004427343 }
 0x24e   :  { %v1019_v63 = vadd.f32 %v1018_v53, %v1017_v45  ;;  %v1020_v6 = vsel %vm990_vm10, %v986_v4, 0.0 }
 0x250   :  { %v1308_v39 = vpop.eup %1307  ;;  %v1021_v56 = vadd.f32 %v1020_v6, %v1019_v63 }
 0x251   :  { %v1310_v44 = vpop.eup %1309  ;;  %v955_v5 = vmul.f32 0.6931472, %v1308_v39 }
 0x252   :  { %v964_v42 = vmul.f32 0.6931472, %v1310_v44 }
 0x253   :  { %v961_v22 = vsel %vm960_vm12, %v958_v36, %v955_v5 }
 0x254   :  { %v987_v13 = vsub.f32 %v735_v3, %v961_v22  ;;  %v970_v59 = vsel %vm969_vm13, %v967_v58, %v964_v42 }
 0x255   :  { %v988_v12 = vsub.f32 %v736_v16, %v970_v59 }
 0x256   :  { %v1022_v8 = vsel %vm990_vm10, %v987_v13, 0.0 }
 0x257   :  { %v1023_v57 = vadd.f32 %v1022_v8, %v1021_v56  ;;  %v1024_v31 = vsel %vm990_vm10, %v988_v12, 0.0 }
 0x259   :  { %v1025_v9 = vadd.f32 %v1024_v31, %v1023_v57 }
 0x25b   :  { %v1026_v11 = vrot.slane %v1025_v9, 4 }
 0x25d   :  { %v1027_v14 = vadd.f32 %v1026_v11, %v1025_v9 }
 0x25f   :  { %v1028_v15 = vrot.slane %v1027_v14, 2 }
 0x261   :  { %v1029_v17 = vadd.f32 %v1028_v15, %v1027_v14 }
 0x263   :  { %v1030_v0 = vrot.slane %v1029_v17, 1 }
 0x265   :  { %v1031_v28 = vadd.f32 %v1030_v0, %v1029_v17 }
 0x267   :  { %v1032_v20 = vsub.f32 %v989_v18, %v1031_v28 }
 0x269   :  { %1034 = vst.msk [vmem:[#allocation2] sm:$0x1] %vm26_vm0, %v1032_v20 }
 0x26a   :  { %1322 = shalt.err (!%p1319_p4)
}
 0x26b   :  { %s1323_s12 = scalar_lea.hbm %s1995_s5, 16 }
 0x26c   :  { %p1324_p5 = scmp.ne.s32.totalorder %s1995_s5, %s1323_s12  ;;  %p1327_p6 = scmp.lt.u32.totalorder %s1323_s12, %s1995_s5 }
 0x26e   :  { %p1329_p7 = pnand %p1327_p6, %p1324_p5 }
 0x270   :  { %1332 = shalt.err (!%p1329_p7)
}
 0x271   :  { %1044 = dma.vmem_to_hbm [thread:$0]  %s1042_s7, 16, %s1995_s5, [#allocation3]  }
 0x272   :  { %1333 = dma.done.wait [#allocation3], 16  }
 0x273   :  { %1334 = vsyncadd [#allocation3], 4294967280 }
 0x274   :  { %1048 = vsyncpa [#allocation3], 1 }

</bundles_post_ra>
